<compile_context>
chip_gen: v7x
topology: tpu7x:2x2x1
jax: 0.10.0
libtpu: 0.0.40
codegen_flags: <defaults>
</compile_context>

<pallas_src>
import functools

import jax
import jax.numpy as jnp
import numpy as np
from jax.experimental import pallas as pl
from jax.experimental.pallas import tpu as pltpu


# ----------------------------------------------------------------------------
# Constant pooling matrices: average pooling over a flattened (N, D, H, W)
# row-index space expressed as a matmul so it runs on the MXU inside the kernel.
# ----------------------------------------------------------------------------
def _avg_matrix(size, k):
    out = size // k
    a = np.zeros((out, size), np.float32)
    for i in range(out):
        a[i, i * k:(i + 1) * k] = 1.0 / k
    return a


def _pool_matrix(n, d, h, w, kd, kh, kw):
    p = np.eye(n, dtype=np.float32)
    for size, k in ((d, kd), (h, kh), (w, kw)):
        p = np.kron(p, _avg_matrix(size, k))
    return p  # shape: (n*(d//kd)*(h//kh)*(w//kw), n*d*h*w)


# ----------------------------------------------------------------------------
# Fused Pallas kernel: stand-in backbone stages + global avg pool + fc
# ----------------------------------------------------------------------------
def _cls_resnet_kernel(x1_ref, w1_ref, p1_ref, w2_ref, p2_ref, w3_ref, p3_ref,
                       wc_ref, bc_ref, o_ref):
    f32 = jnp.float32
    bf16 = jnp.bfloat16

    # --- stage 1: 1x1x1 conv 3->64 + ReLU.  K == 3, so use VPU broadcast-FMA
    #     instead of wasting the MXU on a depth-3 contraction.
    x1 = x1_ref[...]                                     # (M1, 3)  f32
    w1 = w1_ref[...]                                     # (3, 64)  f32
    f1 = x1[:, 0:1] * w1[0:1, :]
    for c in range(1, x1.shape[1]):
        f1 = f1 + x1[:, c:c + 1] * w1[c:c + 1, :]
    f1 = jnp.maximum(f1, 0.0)                            # (M1, 64) f32

    # --- 2x2x2 avg pool (matmul) -> stage 2: 64->128 + ReLU
    x2 = jnp.dot(p1_ref[...], f1.astype(bf16), preferred_element_type=f32)
    y2 = jnp.dot(x2.astype(bf16), w2_ref[...], preferred_element_type=f32)
    y2 = jnp.maximum(y2, 0.0)                            # (M2, 128) f32

    # --- 2x2x2 avg pool -> stage 3: 128->512 + ReLU
    x3 = jnp.dot(p2_ref[...], y2.astype(bf16), preferred_element_type=f32)
    y3 = jnp.dot(x3.astype(bf16), w3_ref[...], preferred_element_type=f32)
    y3 = jnp.maximum(y3, 0.0)                            # (M3, 512) f32

    # --- ClsResNet head: adaptive_avg_pool3d(output_size=1) + Linear(512, C)
    feat = jnp.dot(p3_ref[...], y3.astype(bf16), preferred_element_type=f32)
    logits = jnp.dot(feat.astype(bf16), wc_ref[...], preferred_element_type=f32)
    logits = logits + bc_ref[...]                        # (N, 128) padded lanes
    o_ref[...] = logits.astype(o_ref.dtype)


def _full_spec(shape):
    return pl.BlockSpec(shape, lambda i: (0,) * len(shape))


def cls_resnet_forward(x_ncdhw, params, *, num_classes):
    n, ch, d, h, wd = x_ncdhw.shape
    assert d % 8 == 0 and h % 8 == 0 and wd % 8 == 0, "stand-in backbone needs /8"

    # NCDHW -> NDHWC (channels on the lane axis) + stem 2x2x2 avg pool on the
    # raw 3-channel input (cheap JAX glue on tiny data).
    xt = jnp.transpose(x_ncdhw, (0, 2, 3, 4, 1))
    d1, h1, w1 = d // 2, h // 2, wd // 2
    x1 = xt.reshape(n, d1, 2, h1, 2, w1, 2, ch).mean(axis=(2, 4, 6))
    m1 = n * d1 * h1 * w1
    x1 = x1.reshape(m1, ch).astype(jnp.float32)

    d2, h2, w2 = d1 // 2, h1 // 2, w1 // 2
    d3, h3, w3 = d2 // 2, h2 // 2, w2 // 2
    m2 = n * d2 * h2 * w2
    m3 = n * d3 * h3 * w3

    # pooling matrices (built from static shapes at trace time; 1/8 and 1/4
    # are exact in bf16)
    p1 = jnp.asarray(_pool_matrix(n, d1, h1, w1, 2, 2, 2), jnp.bfloat16)      # (m2, m1)
    p2 = jnp.asarray(_pool_matrix(n, d2, h2, w2, 2, 2, 2), jnp.bfloat16)      # (m3, m2)
    p3 = jnp.asarray(_pool_matrix(n, d3, h3, w3, d3, h3, w3), jnp.bfloat16)   # (n, m3) global pool

    out_pad = pl.pallas_call(
        _cls_resnet_kernel,
        out_shape=jax.ShapeDtypeStruct((n, 128), jnp.float32),
        grid=(1,),
        in_specs=[
            _full_spec((m1, ch)),
            _full_spec((ch, 64)),
            _full_spec((m2, m1)),
            _full_spec((64, 128)),
            _full_spec((m3, m2)),
            _full_spec((128, 512)),
            _full_spec((n, m3)),
            _full_spec((512, 128)),
            _full_spec((1, 128)),
        ],
        out_specs=_full_spec((n, 128)),
        compiler_params=pltpu.CompilerParams(
            dimension_semantics=("arbitrary",)),
    )(x1, params["w1"], p1, params["w2"], p2, params["w3"], p3,
      params["cls_w_pad"], params["cls_b_pad"])

    return out_pad[:, :num_classes]


# ----------------------------------------------------------------------------
# Parameters (deterministic, synthetic)
# ----------------------------------------------------------------------------
def init_params(key, num_classes):
    ks = jax.random.split(key, 5)

    def dense(k, cin, cout):
        return jax.random.normal(k, (cin, cout), jnp.float32) / np.sqrt(cin)

    w1 = dense(ks[0], 3, 64)                                   # stem conv (f32, VPU)
    w2 = dense(ks[1], 64, 128).astype(jnp.bfloat16)
    w3 = dense(ks[2], 128, 512).astype(jnp.bfloat16)
    cls_w = dense(ks[3], 512, num_classes)
    cls_b = 0.05 * jax.random.normal(ks[4], (num_classes,), jnp.float32)

    # pad the classifier to 128 output lanes so the kernel's store is
    # lane-dense; the wrapper slices back to num_classes.
    cls_w_pad = jnp.zeros((512, 128), jnp.float32)
    cls_w_pad = cls_w_pad.at[:, :num_classes].set(cls_w).astype(jnp.bfloat16)
    cls_b_pad = jnp.zeros((1, 128), jnp.float32).at[0, :num_classes].set(cls_b)

    return dict(w1=w1, w2=w2, w3=w3, cls_w_pad=cls_w_pad, cls_b_pad=cls_b_pad)


# ----------------------------------------------------------------------------
# Pure-JAX reference (mirrors the kernel's bf16 cast points)
# ----------------------------------------------------------------------------
def cls_resnet_ref(x_ncdhw, params, num_classes):
    f32, bf16 = jnp.float32, jnp.bfloat16
    n, ch, d, h, wd = x_ncdhw.shape
    xt = jnp.transpose(x_ncdhw, (0, 2, 3, 4, 1))

    def pool2(v):
        nn, dd, hh, ww, cc = v.shape
        return v.reshape(nn, dd // 2, 2, hh // 2, 2, ww // 2, 2, cc).mean(axis=(2, 4, 6))

    x1 = pool2(xt)
    w1 = params["w1"]
    f1 = sum(x1[..., c:c + 1] * w1[c:c + 1, :] for c in range(ch))
    f1 = jnp.maximum(f1, 0.0)

    x2 = pool2(f1.astype(bf16).astype(f32))
    y2 = jnp.maximum(jnp.einsum("ndhwc,co->ndhwo", x2.astype(bf16), params["w2"],
                                preferred_element_type=f32), 0.0)
    x3 = pool2(y2.astype(bf16).astype(f32))
    y3 = jnp.maximum(jnp.einsum("ndhwc,co->ndhwo", x3.astype(bf16), params["w3"],
                                preferred_element_type=f32), 0.0)

    feat = jnp.mean(y3.astype(bf16).astype(f32), axis=(1, 2, 3))  # adaptive_avg_pool3d(1)
    logits = jnp.einsum("nc,co->no", feat.astype(bf16), params["cls_w_pad"],
                        preferred_element_type=f32) + params["cls_b_pad"][0]
    return logits[:, :num_classes]


# ----------------------------------------------------------------------------
if __name__ == "__main__":
    num_classes = 6
    key = jax.random.PRNGKey(0)
    k_x, k_p = jax.random.split(key)

    # PyTorch-style 3D-ResNet input (N, C, D, H, W): the module's
    # adaptive_avg_pool3d implies a 5D feature map from the backbone.
    x = jax.random.normal(k_x, (2, 3, 8, 16, 16), jnp.float32)
    params = init_params(k_p, num_classes)

    fwd = jax.jit(functools.partial(cls_resnet_forward, num_classes=num_classes))
    out = jax.block_until_ready(fwd(x, params))
    assert out.shape == (2, num_classes), out.shape

    ref = jax.block_until_ready(cls_resnet_ref(x, params, num_classes))
    np.testing.assert_allclose(np.asarray(out), np.asarray(ref),
                               rtol=2e-2, atol=2e-3)

    print("KERNEL_OK")
</pallas_src>

<mosaic_0001>
module attributes {stable_mosaic.version = 11 : i64} {
  func.func @_cls_resnet_kernel(%arg0: i32, %arg1: memref<512x3xf32, #tpu.memory_space<vmem>>, %arg2: memref<3x64xf32, #tpu.memory_space<vmem>>, %arg3: memref<64x512xbf16, #tpu.memory_space<vmem>>, %arg4: memref<64x128xbf16, #tpu.memory_space<vmem>>, %arg5: memref<8x64xbf16, #tpu.memory_space<vmem>>, %arg6: memref<128x512xbf16, #tpu.memory_space<vmem>>, %arg7: memref<2x8xbf16, #tpu.memory_space<vmem>>, %arg8: memref<512x128xbf16, #tpu.memory_space<vmem>>, %arg9: memref<1x128xf32, #tpu.memory_space<vmem>>, %arg10: memref<2x128xf32, #tpu.memory_space<vmem>>) attributes {dimension_semantics = [#tpu.dimension_semantics<arbitrary>], iteration_bounds = array<i64: 1>, scalar_prefetch = 0 : i64, scratch_operands = 0 : i64, tpu.core_type = #tpu.core_type<tc>, window_params = [{pipeline_mode = #tpu.pipeline_mode<synchronous>, transform_indices = @transform_0, window_bounds = array<i64: 512, 3>}, {pipeline_mode = #tpu.pipeline_mode<synchronous>, transform_indices = @transform_1, window_bounds = array<i64: 3, 64>}, {pipeline_mode = #tpu.pipeline_mode<synchronous>, transform_indices = @transform_2, window_bounds = array<i64: 64, 512>}, {pipeline_mode = #tpu.pipeline_mode<synchronous>, transform_indices = @transform_3, window_bounds = array<i64: 64, 128>}, {pipeline_mode = #tpu.pipeline_mode<synchronous>, transform_indices = @transform_4, window_bounds = array<i64: 8, 64>}, {pipeline_mode = #tpu.pipeline_mode<synchronous>, transform_indices = @transform_5, window_bounds = array<i64: 128, 512>}, {pipeline_mode = #tpu.pipeline_mode<synchronous>, transform_indices = @transform_6, window_bounds = array<i64: 2, 8>}, {pipeline_mode = #tpu.pipeline_mode<synchronous>, transform_indices = @transform_7, window_bounds = array<i64: 512, 128>}, {pipeline_mode = #tpu.pipeline_mode<synchronous>, transform_indices = @transform_8, window_bounds = array<i64: 1, 128>}, {pipeline_mode = #tpu.pipeline_mode<synchronous>, transform_indices = @transform_9, window_bounds = array<i64: 2, 128>}]} {
    %c0 = arith.constant 0 : index
    %c0_0 = arith.constant 0 : index
    %0 = vector.load %arg1[%c0, %c0_0] : memref<512x3xf32, #tpu.memory_space<vmem>>, vector<512x3xf32>
    %c0_1 = arith.constant 0 : index
    %c0_2 = arith.constant 0 : index
    %1 = vector.load %arg2[%c0_1, %c0_2] : memref<3x64xf32, #tpu.memory_space<vmem>>, vector<3x64xf32>
    %2 = vector.extract_strided_slice %0 {offsets = [0, 0], sizes = [512, 1], strides = [1, 1]} : vector<512x3xf32> to vector<512x1xf32>
    %3 = vector.extract_strided_slice %1 {offsets = [0, 0], sizes = [1, 64], strides = [1, 1]} : vector<3x64xf32> to vector<1x64xf32>
    %4 = vector.broadcast %2 : vector<512x1xf32> to vector<512x64xf32>
    %5 = vector.broadcast %3 : vector<1x64xf32> to vector<512x64xf32>
    %6 = arith.mulf %4, %5 : vector<512x64xf32>
    %7 = vector.extract_strided_slice %0 {offsets = [0, 1], sizes = [512, 1], strides = [1, 1]} : vector<512x3xf32> to vector<512x1xf32>
    %8 = vector.extract_strided_slice %1 {offsets = [1, 0], sizes = [1, 64], strides = [1, 1]} : vector<3x64xf32> to vector<1x64xf32>
    %9 = vector.broadcast %7 : vector<512x1xf32> to vector<512x64xf32>
    %10 = vector.broadcast %8 : vector<1x64xf32> to vector<512x64xf32>
    %11 = arith.mulf %9, %10 : vector<512x64xf32>
    %12 = arith.addf %6, %11 : vector<512x64xf32>
    %13 = vector.extract_strided_slice %0 {offsets = [0, 2], sizes = [512, 1], strides = [1, 1]} : vector<512x3xf32> to vector<512x1xf32>
    %14 = vector.extract_strided_slice %1 {offsets = [2, 0], sizes = [1, 64], strides = [1, 1]} : vector<3x64xf32> to vector<1x64xf32>
    %15 = vector.broadcast %13 : vector<512x1xf32> to vector<512x64xf32>
    %16 = vector.broadcast %14 : vector<1x64xf32> to vector<512x64xf32>
    %17 = arith.mulf %15, %16 : vector<512x64xf32>
    %18 = arith.addf %12, %17 : vector<512x64xf32>
    %cst = arith.constant 0.000000e+00 : f32
    %19 = vector.broadcast %cst : f32 to vector<512x64xf32>
    %20 = arith.maximumf %18, %19 : vector<512x64xf32>
    %c0_3 = arith.constant 0 : index
    %c0_4 = arith.constant 0 : index
    %21 = vector.load %arg3[%c0_3, %c0_4] : memref<64x512xbf16, #tpu.memory_space<vmem>>, vector<64x512xbf16>
    %22 = arith.truncf %20 : vector<512x64xf32> to vector<512x64xbf16>
    %cst_5 = arith.constant dense<0.000000e+00> : vector<64x64xf32>
    %23 = tpu.matmul %21, %22, %cst_5 {dimension_numbers = #tpu.dot_dimension_numbers<[1], [0], [0], [1], [0, 0, 1, 1], [], []>} : vector<64x512xbf16>, vector<512x64xbf16>, vector<64x64xf32> -> vector<64x64xf32>
    %24 = arith.truncf %23 : vector<64x64xf32> to vector<64x64xbf16>
    %c0_6 = arith.constant 0 : index
    %c0_7 = arith.constant 0 : index
    %25 = vector.load %arg4[%c0_6, %c0_7] : memref<64x128xbf16, #tpu.memory_space<vmem>>, vector<64x128xbf16>
    %cst_8 = arith.constant dense<0.000000e+00> : vector<64x128xf32>
    %26 = tpu.matmul %24, %25, %cst_8 {dimension_numbers = #tpu.dot_dimension_numbers<[1], [0], [0], [1], [0, 0, 1, 1], [], []>} : vector<64x64xbf16>, vector<64x128xbf16>, vector<64x128xf32> -> vector<64x128xf32>
    %cst_9 = arith.constant 0.000000e+00 : f32
    %27 = vector.broadcast %cst_9 : f32 to vector<64x128xf32>
    %28 = arith.maximumf %26, %27 : vector<64x128xf32>
    %c0_10 = arith.constant 0 : index
    %c0_11 = arith.constant 0 : index
    %29 = vector.load %arg5[%c0_10, %c0_11] : memref<8x64xbf16, #tpu.memory_space<vmem>>, vector<8x64xbf16>
    %30 = arith.truncf %28 : vector<64x128xf32> to vector<64x128xbf16>
    %cst_12 = arith.constant dense<0.000000e+00> : vector<8x128xf32>
    %31 = tpu.matmul %29, %30, %cst_12 {dimension_numbers = #tpu.dot_dimension_numbers<[1], [0], [0], [1], [0, 0, 1, 1], [], []>} : vector<8x64xbf16>, vector<64x128xbf16>, vector<8x128xf32> -> vector<8x128xf32>
    %32 = arith.truncf %31 : vector<8x128xf32> to vector<8x128xbf16>
    %c0_13 = arith.constant 0 : index
    %c0_14 = arith.constant 0 : index
    %33 = vector.load %arg6[%c0_13, %c0_14] : memref<128x512xbf16, #tpu.memory_space<vmem>>, vector<128x512xbf16>
    %cst_15 = arith.constant dense<0.000000e+00> : vector<8x512xf32>
    %34 = tpu.matmul %32, %33, %cst_15 {dimension_numbers = #tpu.dot_dimension_numbers<[1], [0], [0], [1], [0, 0, 1, 1], [], []>} : vector<8x128xbf16>, vector<128x512xbf16>, vector<8x512xf32> -> vector<8x512xf32>
    %cst_16 = arith.constant 0.000000e+00 : f32
    %35 = vector.broadcast %cst_16 : f32 to vector<8x512xf32>
    %36 = arith.maximumf %34, %35 : vector<8x512xf32>
    %c0_17 = arith.constant 0 : index
    %c0_18 = arith.constant 0 : index
    %37 = vector.load %arg7[%c0_17, %c0_18] : memref<2x8xbf16, #tpu.memory_space<vmem>>, vector<2x8xbf16>
    %38 = arith.truncf %36 : vector<8x512xf32> to vector<8x512xbf16>
    %cst_19 = arith.constant dense<0.000000e+00> : vector<2x512xf32>
    %39 = tpu.matmul %37, %38, %cst_19 {dimension_numbers = #tpu.dot_dimension_numbers<[1], [0], [0], [1], [0, 0, 1, 1], [], []>} : vector<2x8xbf16>, vector<8x512xbf16>, vector<2x512xf32> -> vector<2x512xf32>
    %40 = arith.truncf %39 : vector<2x512xf32> to vector<2x512xbf16>
    %c0_20 = arith.constant 0 : index
    %c0_21 = arith.constant 0 : index
    %41 = vector.load %arg8[%c0_20, %c0_21] : memref<512x128xbf16, #tpu.memory_space<vmem>>, vector<512x128xbf16>
    %cst_22 = arith.constant dense<0.000000e+00> : vector<2x128xf32>
    %42 = tpu.matmul %40, %41, %cst_22 {dimension_numbers = #tpu.dot_dimension_numbers<[1], [0], [0], [1], [0, 0, 1, 1], [], []>} : vector<2x512xbf16>, vector<512x128xbf16>, vector<2x128xf32> -> vector<2x128xf32>
    %c0_23 = arith.constant 0 : index
    %c0_24 = arith.constant 0 : index
    %43 = vector.load %arg9[%c0_23, %c0_24] : memref<1x128xf32, #tpu.memory_space<vmem>>, vector<1x128xf32>
    %44 = vector.broadcast %43 : vector<1x128xf32> to vector<2x128xf32>
    %45 = arith.addf %42, %44 : vector<2x128xf32>
    %c0_25 = arith.constant 0 : index
    %c0_26 = arith.constant 0 : index
    %46 = vector.load %arg10[%c0_25, %c0_26] : memref<2x128xf32, #tpu.memory_space<vmem>>, vector<2x128xf32>
    tpu.vector_store %arg10[%c0_25, %c0_26], %45 {strides = array<i32>} : memref<2x128xf32, #tpu.memory_space<vmem>>, vector<2x128xf32>,
    return
  }
  func.func @transform_0(%arg0: i32) -> (i32, i32) {
    %c0_i32 = arith.constant 0 : i32
    %c0_i32_0 = arith.constant 0 : i32
    %c0_i32_1 = arith.constant 0 : i32
    return %c0_i32, %c0_i32_0 : i32, i32
  }
  func.func @transform_1(%arg0: i32) -> (i32, i32) {
    %c0_i32 = arith.constant 0 : i32
    %c0_i32_0 = arith.constant 0 : i32
    %c0_i32_1 = arith.constant 0 : i32
    return %c0_i32, %c0_i32_0 : i32, i32
  }
  func.func @transform_2(%arg0: i32) -> (i32, i32) {
    %c0_i32 = arith.constant 0 : i32
    %c0_i32_0 = arith.constant 0 : i32
    %c0_i32_1 = arith.constant 0 : i32
    return %c0_i32, %c0_i32_0 : i32, i32
  }
  func.func @transform_3(%arg0: i32) -> (i32, i32) {
    %c0_i32 = arith.constant 0 : i32
    %c0_i32_0 = arith.constant 0 : i32
    %c0_i32_1 = arith.constant 0 : i32
    return %c0_i32, %c0_i32_0 : i32, i32
  }
  func.func @transform_4(%arg0: i32) -> (i32, i32) {
    %c0_i32 = arith.constant 0 : i32
    %c0_i32_0 = arith.constant 0 : i32
    %c0_i32_1 = arith.constant 0 : i32
    return %c0_i32, %c0_i32_0 : i32, i32
  }
  func.func @transform_5(%arg0: i32) -> (i32, i32) {
    %c0_i32 = arith.constant 0 : i32
    %c0_i32_0 = arith.constant 0 : i32
    %c0_i32_1 = arith.constant 0 : i32
    return %c0_i32, %c0_i32_0 : i32, i32
  }
  func.func @transform_6(%arg0: i32) -> (i32, i32) {
    %c0_i32 = arith.constant 0 : i32
    %c0_i32_0 = arith.constant 0 : i32
    %c0_i32_1 = arith.constant 0 : i32
    return %c0_i32, %c0_i32_0 : i32, i32
  }
  func.func @transform_7(%arg0: i32) -> (i32, i32) {
    %c0_i32 = arith.constant 0 : i32
    %c0_i32_0 = arith.constant 0 : i32
    %c0_i32_1 = arith.constant 0 : i32
    return %c0_i32, %c0_i32_0 : i32, i32
  }
  func.func @transform_8(%arg0: i32) -> (i32, i32) {
    %c0_i32 = arith.constant 0 : i32
    %c0_i32_0 = arith.constant 0 : i32
    %c0_i32_1 = arith.constant 0 : i32
    return %c0_i32, %c0_i32_0 : i32, i32
  }
  func.func @transform_9(%arg0: i32) -> (i32, i32) {
    %c0_i32 = arith.constant 0 : i32
    %c0_i32_0 = arith.constant 0 : i32
    %c0_i32_1 = arith.constant 0 : i32
    return %c0_i32, %c0_i32_0 : i32, i32
  }
}

</mosaic_0001>

<bundles_post_ra>
// kernel: cls_resnet_forward.1
= control target key start
LH: loop header
LB: loop body
LE: loop exit
PB: predicated region body
PF: predicated region fallthrough
CT: control target
= control target key end

     0   :  { %v4300_v2 = vmov 0   ;;  %v4298_v6 = vmov 1   ;;  %v4296_v18 = vmov 2   ;;  %s4286_s0 = inlined_call_operand.vmem [shape: f32[512,3], index: 0, kind: input, shape index: {}]   ;;  %s4287_s1 = inlined_call_operand.vmem [shape: f32[3,64], index: 1, kind: input, shape index: {}]   ;;  %s4288_s2 = inlined_call_operand.vmem [shape: bf16[64,512], index: 2, kind: input, shape index: {}]   ;;  %s4289_s3 = inlined_call_operand.vmem [shape: bf16[64,128], index: 3, kind: input, shape index: {}]   ;;  %s4290_s4 = inlined_call_operand.vmem [shape: bf16[8,64], index: 4, kind: input, shape index: {}]   ;;  %s4291_s5 = inlined_call_operand.vmem [shape: bf16[128,512], index: 5, kind: input, shape index: {}]   ;;  %s4292_s6 = inlined_call_operand.vmem [shape: bf16[2,8], index: 6, kind: input, shape index: {}]   ;;  %s4293_s7 = inlined_call_operand.vmem [shape: bf16[512,128], index: 7, kind: input, shape index: {}]   ;;  %s4294_s8 = inlined_call_operand.vmem [shape: f32[1,128], index: 8, kind: input, shape index: {}]   ;;  %s4295_s9 = inlined_call_operand.hbm [shape: f32[2,128], index: 9, kind: output, shape index: {}]  }
   0x1   :  { %v82_v0 = vld [vmem:[%s4286_s0 + $0x180] sm:$0xff]  ;;  %2766 = vset.pattern.permute.xlu1 %v4300_v2  ;;  %2765 = vset.pattern.permute.xlu0 %v4300_v2  ;;  %v3018_v3 = vld [vmem:[%s4286_s0 + $0x188] sm:$0xff]  ;;  %v3035_v7 = vld [vmem:[%s4286_s0 + $0x90] sm:$0xff] }
   0x2   :  { %v3010_v1 = vld [vmem:[%s4286_s0 + $0x80] sm:$0xff]  ;;  %341 = vperm.xlu1 %2766, %v82_v0   ;;  %v3023_v4 = vld [vmem:[%s4286_s0 + $0x88] sm:$0xff]  ;;  %v3041_v8 = vld [vmem:[%s4286_s0 + $0x198] sm:$0xff] }
   0x3   :  { %181 = vperm.xlu0 %2765, %v3010_v1   ;;  %v35_v5 = vld [vmem:[%s4286_s0 + $0x8] sm:$0xff]  ;;  %v3046_v9 = vld [vmem:[%s4286_s0] sm:$0xff]  ;;  %v3052_v10 = vld [vmem:[%s4286_s0 + $0x10] sm:$0xff] }
   0x4   :  { %v3059_v11 = vld [vmem:[%s4286_s0 + $0x100] sm:$0xff]  ;;  %v3065_v12 = vld [vmem:[%s4286_s0 + $0x118] sm:$0xff]  ;;  %v3070_v13 = vld [vmem:[%s4286_s0 + $0x108] sm:$0xff] }
   0x5   :  { %v3077_v14 = vld [vmem:[%s4286_s0 + $0xa8] sm:$0xff]  ;;  %v3091_v16 = vld [vmem:[%s4286_s0 + $0xb0] sm:$0xff]  ;;  %v3098_v17 = vld [vmem:[%s4286_s0 + $0x1b8] sm:$0xff] }
   0x6   :  { %346 = vperm.xlu1 %2766, %v3018_v3   ;;  %v3084_v15 = vld [vmem:[%s4286_s0 + $0x28] sm:$0xff]  ;;  %v3106_v19 = vld [vmem:[%s4286_s0 + $0x30] sm:$0xff]  ;;  %v3112_v20 = vld [vmem:[%s4286_s0 + $0x138] sm:$0xff] }
   0x7   :  { %186 = vperm.xlu0 %2765, %v3023_v4   ;;  %v3119_v21 = vld [vmem:[%s4286_s0 + $0xc8] sm:$0xff] }
   0x8   :  { %v3125_v22 = vld [vmem:[%s4286_s0 + $0x48] sm:$0xff] }
   0xa   :  { %2767 = vset.pattern.permute.xlu1 %v4298_v6 }
   0xb   :  { %106 = vperm.xlu0 %2765, %v35_v5   ;;  %556 = vperm.xlu1 %2767, %v3023_v4  }
   0xf   :  { %191 = vperm.xlu0 %2765, %v3035_v7   ;;  %680 = vperm.xlu1 %2767, %v82_v0  }
  0x13   :  { %356 = vperm.xlu0 %2765, %v3041_v8   ;;  %2768 = vset.pattern.permute.xlu1 %v4300_v2 }
  0x14   :  { %101 = vperm.xlu1 %2768, %v3046_v9  }
  0x17   :  { %111 = vperm.xlu0 %2765, %v3052_v10  }
  0x18   :  { %261 = vperm.xlu1 %2768, %v3059_v11  }
  0x1b   :  { %276 = vperm.xlu0 %2765, %v3065_v12  }
  0x1c   :  { %266 = vperm.xlu1 %2768, %v3070_v13  }
  0x1f   :  { %206 = vperm.xlu0 %2765, %v3077_v14  }
  0x20   :  { %2769 = vset.pattern.permute.xlu1 %v4298_v6 }
  0x21   :  { %492 = vperm.xlu1 %2769, %v35_v5  }
  0x23   :  { %126 = vperm.xlu0 %2765, %v3084_v15  }
  0x25   :  { %616 = vperm.xlu1 %2769, %v3059_v11  }
  0x27   :  { %211 = vperm.xlu0 %2765, %v3091_v16  }
  0x29   :  { %2770 = vset.pattern.permute.xlu1 %v4296_v18 }
  0x2a   :  { %940 = vperm.xlu1 %2770, %v3010_v1  }
  0x2b   :  { %376 = vperm.xlu0 %2765, %v3098_v17  }
  0x2e   :  { %1068 = vperm.xlu1 %2770, %v82_v0  }
  0x2f   :  { %131 = vperm.xlu0 %2765, %v3106_v19  }
  0x32   :  { %1072 = vperm.xlu1 %2770, %v3018_v3  }
  0x33   :  { %296 = vperm.xlu0 %2765, %v3112_v20  }
  0x36   :  { %880 = vperm.xlu1 %2770, %v35_v5  }
  0x37   :  { %226 = vperm.xlu0 %2765, %v3119_v21  }
  0x38   :  { %14 = vsyncpa [#allocation3], 0  ;;  %v3132_v23 = vld [vmem:[%s4286_s0 + $0xd0] sm:$0xff]  ;;  %v53_v24 = vld [vmem:[%s4286_s0 + $0x98] sm:$0xff]  ;;  %vm1621_vm0 = vcmask 523264   ;;  %vm2952_vm1 = vmmov 0  }
  0x39   :  { %v3142_v25 = vld [vmem:[%s4286_s0 + $0x1d8] sm:$0xff]  ;;  %v84_v26 = vld [vmem:[%s4286_s0 + $0x190] sm:$0xff]  ;;  %v3165_v29 = vld [vmem:[%s4286_s0 + $0xe8] sm:$0xff]  ;;  %vm2043_vm2 = vcmask 1043456   ;;  %vm2039_vm3 = vcmask 64512   ;;  %s2953_s19 = smov [#allocation2]  }
  0x3a   :  { %1008 = vperm.xlu1 %2770, %v3070_v13   ;;  %v3151_v27 = vld [vmem:[%s4286_s0 + $0x50] sm:$0xff]  ;;  %v3158_v28 = vld [vmem:[%s4286_s0 + $0x158] sm:$0xff]  ;;  %v47_v30 = vld [vmem:[%s4286_s0 + $0x68] sm:$0xff] }
  0x3b   :  { %146 = vperm.xlu0 %2765, %v3125_v22   ;;  %4314 = vst [vmem:[#allocation5_spill] sm:$0xff] %v3151_v27  ;;  %v3175_v31 = vld [vmem:[%s4286_s0 + $0x18] sm:$0xff]  ;;  %v3180_v32 = vld [vmem:[%s4286_s0 + $0xf0] sm:$0xff]  ;;  %v54_v37 = vld [vmem:[%s4286_s0 + $0xa0] sm:$0xff] }
  0x3c   :  { %v68_v33 = vld [vmem:[%s4286_s0 + $0x110] sm:$0xff]  ;;  %v3191_v34 = vld [vmem:[%s4286_s0 + $0x1f8] sm:$0xff]  ;;  %v86_v38 = vld [vmem:[%s4286_s0 + $0x1a0] sm:$0xff] }
  0x3d   :  { %v48_v35 = vld [vmem:[%s4286_s0 + $0x70] sm:$0xff]  ;;  %v3202_v36 = vld [vmem:[%s4286_s0 + $0x178] sm:$0xff]  ;;  %v87_v39 = vld [vmem:[%s4286_s0 + $0x1a8] sm:$0xff] }
  0x3e   :  { %2771 = vset.pattern.permute.xlu1 %v4300_v2  ;;  %v3231_v42 = vld [vmem:[%s4286_s0 + $0x20] sm:$0xff]  ;;  %v71_v45 = vld [vmem:[%s4286_s0 + $0x128] sm:$0xff]  ;;  %v3250_v48 = vld [vmem:[%s4286_s0 + $0xb8] sm:$0xff] }
  0x3f   :  { %231 = vperm.xlu0 %2765, %v3132_v23   ;;  %196 = vperm.xlu1 %2771, %v53_v24   ;;  %v3260_v51 = vld [vmem:[%s4286_s0 + $0x38] sm:$0xff]  ;;  %v3272_v54 = vld [vmem:[%s4286_s0 + $0x120] sm:$0xff]  ;;  %v3288_v58 = vld [vmem:[%s4286_s0 + $0x1c8] sm:$0xff] }
  0x40   :  { %v3277_v55 = vld [vmem:[%s4286_s0 + $0xc0] sm:$0xff]  ;;  %v3310_v0 = vld [vmem:[%s4286_s0 + $0x148] sm:$0xff]  ;;  %v3321_v5 = vld [vmem:[%s4286_s0 + $0xd8] sm:$0xff] }
  0x41   :  { %v3298_v61 = vld [vmem:[%s4286_s0 + $0x40] sm:$0xff] }
  0x43   :  { %396 = vperm.xlu0 %2765, %v3142_v25   ;;  %351 = vperm.xlu1 %2771, %v84_v26  }
  0x47   :  { %151 = vperm.xlu0 %2765, %v3151_v27   ;;  %2772 = vset.pattern.permute.xlu1 %v4298_v6 }
  0x48   :  { %560 = vperm.xlu1 %2772, %v3035_v7  }
  0x4b   :  { %316 = vperm.xlu0 %2765, %v3158_v28  }
  0x4c   :  { %688 = vperm.xlu1 %2772, %v84_v26  }
  0x4f   :  { %246 = vperm.xlu0 %2765, %v3165_v29  }
  0x50   :  { %692 = vperm.xlu1 %2772, %v3041_v8  }
  0x53   :  { %166 = vperm.xlu0 %2765, %v47_v30   ;;  %v3340_v30 = vld [vmem:[%s4286_s0 + $0xe0] sm:$0xff] }
  0x54   :  { %2773 = vset.pattern.permute.xlu1 %v4300_v2  ;;  %4321 = vst [vmem:[#allocation12_spill] sm:$0xff] %v3340_v30 }
  0x55   :  { %116 = vperm.xlu1 %2773, %v3175_v31  }
  0x57   :  { %251 = vperm.xlu0 %2765, %v3180_v32  }
  0x59   :  { %271 = vperm.xlu1 %2773, %v68_v33  }
  0x5b   :  { %416 = vperm.xlu0 %2765, %v3191_v34  }
  0x5d   :  { %2774 = vset.pattern.permute.xlu1 %v4298_v6 }
  0x5e   :  { %496 = vperm.xlu1 %2774, %v3052_v10  }
  0x5f   :  { %171 = vperm.xlu0 %2765, %v48_v35  }
  0x62   :  { %624 = vperm.xlu1 %2774, %v68_v33  }
  0x63   :  { %336 = vperm.xlu0 %2765, %v3202_v36  }
  0x66   :  { %628 = vperm.xlu1 %2774, %v3065_v12  }
  0x67   :  { %2804 = vset.pattern.permute.xlu0 %v4298_v6 }
  0x68   :  { %552 = vperm.xlu0 %2804, %v3010_v1  }
  0x6a   :  { %2775 = vset.pattern.permute.xlu1 %v4296_v18 }
  0x6b   :  { %952 = vperm.xlu1 %2775, %v53_v24  }
  0x6c   :  { %684 = vperm.xlu0 %2804, %v3018_v3  }
  0x6f   :  { %1076 = vperm.xlu1 %2775, %v84_v26  }
  0x70   :  { %488 = vperm.xlu0 %2804, %v3046_v9  }
  0x73   :  { %884 = vperm.xlu1 %2775, %v3052_v10  }
  0x74   :  { %620 = vperm.xlu0 %2804, %v3070_v13   ;;  %v3330_v13 = vld [vmem:[%s4286_s0 + $0x58] sm:$0xff] }
  0x77   :  { %1012 = vperm.xlu1 %2775, %v68_v33  }
  0x78   :  { %564 = vperm.xlu0 %2804, %v53_v24  }
  0x7b   :  { %2776 = vset.pattern.permute.xlu1 %v4300_v2 }
  0x7c   :  { %500 = vperm.xlu0 %2804, %v3175_v31   ;;  %201 = vperm.xlu1 %2776, %v54_v37  }
  0x80   :  { %568 = vperm.xlu0 %2804, %v54_v37   ;;  %361 = vperm.xlu1 %2776, %v86_v38  }
  0x81   :  { %v3224_v40 = vpop.permute.xlu1 %341 }
  0x82   :  { %v3226_v41 = vpop.permute.xlu0 %181 }
  0x84   :  { %700 = vperm.xlu0 %2804, %v87_v39   ;;  %366 = vperm.xlu1 %2776, %v87_v39  }
  0x85   :  { %v3233_v43 = vpop.permute.xlu1 %346 }
  0x86   :  { %v3235_v44 = vpop.permute.xlu0 %186 }
  0x88   :  { %504 = vperm.xlu0 %2804, %v3231_v42   ;;  %2777 = vset.pattern.permute.xlu1 %v4298_v6 }
  0x89   :  { %572 = vperm.xlu1 %2777, %v3077_v14  }
  0x8a   :  { %v3243_v46 = vpop.permute.xlu0 %106  ;;  %v3245_v47 = vpop.permute.xlu1 %556 }
  0x8c   :  { %636 = vperm.xlu0 %2804, %v71_v45  }
  0x8d   :  { %696 = vperm.xlu1 %2777, %v86_v38  }
  0x8e   :  { %v3252_v49 = vpop.permute.xlu0 %191  ;;  %v3254_v50 = vpop.permute.xlu1 %680 }
  0x90   :  { %580 = vperm.xlu0 %2804, %v3250_v48  }
  0x91   :  { %2778 = vset.pattern.permute.xlu1 %v4300_v2 }
  0x92   :  { %v3263_v52 = vpop.permute.xlu0 %356  ;;  %121 = vperm.xlu1 %2778, %v3231_v42  }
  0x93   :  { %v3267_v53 = vpop.permute.xlu1 %101 }
  0x94   :  { %516 = vperm.xlu0 %2804, %v3260_v51  }
  0x96   :  { %v3279_v56 = vpop.permute.xlu0 %111  ;;  %281 = vperm.xlu1 %2778, %v3272_v54  }
  0x97   :  { %4315 = vst [vmem:[#allocation6_spill] sm:$0xff] %v3279_v56  ;;  %v3283_v57 = vpop.permute.xlu1 %261 }
  0x98   :  { %584 = vperm.xlu0 %2804, %v3277_v55  }
  0x9a   :  { %v3290_v59 = vpop.permute.xlu0 %276  ;;  %286 = vperm.xlu1 %2778, %v71_v45  }
  0x9b   :  { %4316 = vst [vmem:[#allocation7_spill] sm:$0xff] %v3290_v59  ;;  %v3293_v60 = vpop.permute.xlu1 %266 }
  0x9c   :  { %716 = vperm.xlu0 %2804, %v3288_v58  }
  0x9e   :  { %v3300_v62 = vpop.permute.xlu0 %206  ;;  %2779 = vset.pattern.permute.xlu1 %v4298_v6  ;;  %v3361_v6 = vld [vmem:[%s4286_s0 + $0x60] sm:$0xff] }
  0x9f   :  { %4317 = vst [vmem:[#allocation8_spill] sm:$0xff] %v3300_v62  ;;  %508 = vperm.xlu1 %2779, %v3084_v15   ;;  %4325 = vst [vmem:[#allocation16_spill] sm:$0xff] %v3361_v6 }
  0xa0   :  { %520 = vperm.xlu0 %2804, %v3298_v61   ;;  %v3305_v63 = vpop.permute.xlu1 %492 }
  0xa2   :  { %v3312_v1 = vpop.permute.xlu0 %126 }
  0xa3   :  { %4318 = vst [vmem:[#allocation9_spill] sm:$0xff] %v3312_v1  ;;  %632 = vperm.xlu1 %2779, %v3272_v54  }
  0xa4   :  { %652 = vperm.xlu0 %2804, %v3310_v0   ;;  %v3316_v3 = vpop.permute.xlu1 %616 }
  0xa6   :  { %v3323_v10 = vpop.permute.xlu0 %211 }
  0xa7   :  { %4319 = vst [vmem:[#allocation10_spill] sm:$0xff] %v3323_v10  ;;  %2780 = vset.pattern.permute.xlu1 %v4296_v18 }
  0xa8   :  { %596 = vperm.xlu0 %2804, %v3321_v5   ;;  %956 = vperm.xlu1 %2780, %v54_v37   ;;  %v3350_v37 = vld [vmem:[%s4286_s0 + $0x1e8] sm:$0xff] }
  0xa9   :  { %v3332_v24 = vpop.permute.xlu1 %940  ;;  %4323 = vst [vmem:[#allocation14_spill] sm:$0xff] %v3350_v37 }
  0xaa   :  { %v3334_v26 = vpop.permute.xlu0 %376 }
  0xab   :  { %4320 = vst [vmem:[#allocation11_spill] sm:$0xff] %v3334_v26  ;;  %v3390_v26 = vld [vmem:[%s4286_s0 + $0x1b0] sm:$0xff] }
  0xac   :  { %532 = vperm.xlu0 %2804, %v3330_v13   ;;  %1084 = vperm.xlu1 %2780, %v86_v38  }
  0xad   :  { %v3342_v33 = vpop.permute.xlu1 %1068 }
  0xae   :  { %v3344_v35 = vpop.permute.xlu0 %131 }
  0xaf   :  { %4322 = vst [vmem:[#allocation13_spill] sm:$0xff] %v3344_v35 }
  0xb0   :  { %600 = vperm.xlu0 %2804, %v3340_v30   ;;  %1088 = vperm.xlu1 %2780, %v87_v39   ;;  %v4329_v30 = vmov 0  }
  0xb1   :  { %v3352_v18 = vpop.permute.xlu1 %1072 }
  0xb2   :  { %v3354_v38 = vpop.permute.xlu0 %296 }
  0xb3   :  { %4324 = vst [vmem:[#allocation15_spill] sm:$0xff] %v3354_v38  ;;  %v3371_v38 = vld [vmem:[%s4286_s0 + $0x168] sm:$0xff] }
  0xb4   :  { %732 = vperm.xlu0 %2804, %v3350_v37   ;;  %896 = vperm.xlu1 %2780, %v3084_v15   ;;  %4327 = vst [vmem:[#allocation18_spill] sm:$0xff] %v3371_v38 }
  0xb5   :  { %v3363_v2 = vpop.permute.xlu1 %880 }
  0xb6   :  { %v3365_v39 = vpop.permute.xlu0 %226 }
  0xb7   :  { %4326 = vst [vmem:[#allocation17_spill] sm:$0xff] %v3365_v39  ;;  %v65_v39 = vld [vmem:[%s4286_s0 + $0xf8] sm:$0xff] }
  0xb8   :  { %536 = vperm.xlu0 %2804, %v3361_v6   ;;  %1024 = vperm.xlu1 %2780, %v71_v45  }
  0xb9   :  { %v3373_v37 = vpop.permute.xlu1 %1008 }
  0xba   :  { %v3375_v15 = vpop.permute.xlu0 %146 }
  0xbb   :  { %4328 = vst [vmem:[#allocation19_spill] sm:$0xff] %v3375_v15  ;;  %v3395_v15 = vld [vmem:[%s4286_s0 + $0x78] sm:$0xff] }
  0xbc   :  { %668 = vperm.xlu0 %2804, %v3371_v38   ;;  %2781 = vset.pattern.permute.xlu1 %v4329_v30 }
  0xbd   :  { %216 = vperm.xlu1 %2781, %v3250_v48  }
  0xbe   :  { %v3383_v45 = vpop.permute.xlu0 %231  ;;  %v3385_v35 = vpop.permute.xlu1 %196 }
  0xbf   :  { %4330 = vst [vmem:[#allocation20_spill] sm:$0xff] %v3383_v45  ;;  %v4333_v45 = vmov 1  }
  0xc0   :  { %612 = vperm.xlu0 %2804, %v65_v39   ;;  %v4335_v39 = vmov 2  }
  0xc1   :  { %371 = vperm.xlu1 %2781, %v3390_v26  }
  0xc2   :  { %v3398_v38 = vpop.permute.xlu0 %396  ;;  %v3400_v10 = vpop.permute.xlu1 %351 }
  0xc3   :  { %4331 = vst [vmem:[#allocation21_spill] sm:$0xff] %v3398_v38  ;;  %4332 = vst [vmem:[#allocation22_spill] sm:$0xff] %v3400_v10 }
  0xc4   :  { %548 = vperm.xlu0 %2804, %v3395_v15  }
  0xc5   :  { %2782 = vset.pattern.permute.xlu1 %v4333_v45 }
  0xc6   :  { %v3404_v1 = vpop.permute.xlu0 %151  ;;  %576 = vperm.xlu1 %2782, %v3091_v16  }
  0xc7   :  { %4334 = vst [vmem:[#allocation23_spill] sm:$0xff] %v3404_v1  ;;  %v3408_v27 = vpop.permute.xlu1 %560 }
  0xc8   :  { %2806 = vset.pattern.permute.xlu0 %v4335_v39 }
  0xc9   :  { %944 = vperm.xlu0 %2806, %v3023_v4  }
  0xca   :  { %v3411_v62 = vpop.permute.xlu0 %316  ;;  %704 = vperm.xlu1 %2782, %v3390_v26  }
  0xcb   :  { %4336 = vst [vmem:[#allocation24_spill] sm:$0xff] %v3411_v62  ;;  %v3414_v38 = vpop.permute.xlu1 %688 }
  0xcd   :  { %876 = vperm.xlu0 %2806, %v3046_v9   ;;  %v72_v9 = vld [vmem:[%s4286_s0 + $0x130] sm:$0xff] }
  0xce   :  { %v3417_v59 = vpop.permute.xlu0 %246  ;;  %708 = vperm.xlu1 %2782, %v3098_v17  }
  0xcf   :  { %4337 = vst [vmem:[#allocation25_spill] sm:$0xff] %v3417_v59  ;;  %v3420_v1 = vpop.permute.xlu1 %692 }
  0xd0   :  { %4338 = vst [vmem:[#allocation26_spill] sm:$0xff] %v3420_v1 }
  0xd1   :  { %1004 = vperm.xlu0 %2806, %v3059_v11  }
  0xd2   :  { %v3423_v56 = vpop.permute.xlu0 %166  ;;  %2783 = vset.pattern.permute.xlu1 %v4329_v30 }
  0xd3   :  { %4339 = vst [vmem:[#allocation27_spill] sm:$0xff] %v3423_v56  ;;  %136 = vperm.xlu1 %2783, %v3260_v51   ;;  %v419_v56 = vlaneseq }
  0xd4   :  { %v3428_v4 = vpop.permute.xlu1 %116 }
  0xd5   :  { %948 = vperm.xlu0 %2806, %v3035_v7   ;;  %4340 = vst [vmem:[#allocation28_spill] sm:$0xff] %v3428_v4  ;;  %v420_v7 = vshrl.u32 %v419_v56, 7 }
  0xd6   :  { %v3433_v59 = vpop.permute.xlu0 %251 }
  0xd7   :  { %4341 = vst [vmem:[#allocation29_spill] sm:$0xff] %v3433_v59  ;;  %291 = vperm.xlu1 %2783, %v72_v9   ;;  %v745_v59 = vsub.s32 1, %v420_v7 }
  0xd8   :  { %v3436_v11 = vpop.permute.xlu1 %271 }
  0xd9   :  { %1080 = vperm.xlu0 %2806, %v3041_v8   ;;  %4342 = vst [vmem:[#allocation30_spill] sm:$0xff] %v3436_v11  ;;  %v421_v8 = vsub.s32 0, %v420_v7 }
  0xda   :  { %v3438_v62 = vpop.permute.xlu0 %416 }
  0xdb   :  { %4343 = vst [vmem:[#allocation31_spill] sm:$0xff] %v3438_v62  ;;  %2784 = vset.pattern.permute.xlu1 %v4333_v45  ;;  %v1133_v62 = vsub.s32 2, %v420_v7 }
  0xdc   :  { %512 = vperm.xlu1 %2784, %v3106_v19  }
  0xdd   :  { %888 = vperm.xlu0 %2806, %v3175_v31   ;;  %v3443_v4 = vpop.permute.xlu1 %496  ;;  %v98_v31 = vld [vmem:[%s4287_s1] sm:$0x7] }
  0xde   :  { %4344 = vst [vmem:[#allocation32_spill] sm:$0xff] %v3443_v4  ;;  %v3445_v10 = vpop.permute.xlu0 %171  ;;  %v3457_v56 = vrot.slane %v98_v31, %v421_v8 }
  0xdf   :  { %4345 = vst [vmem:[#allocation33_spill] sm:$0xff] %v3445_v10  ;;  %v3459_v10 = vrot.slane %v98_v31, %v745_v59 }
  0xe0   :  { %640 = vperm.xlu1 %2784, %v72_v9  }
  0xe1   :  { %1016 = vperm.xlu0 %2806, %v3065_v12   ;;  %v3448_v11 = vpop.permute.xlu1 %624 }
  0xe2   :  { %4346 = vst [vmem:[#allocation34_spill] sm:$0xff] %v3448_v11  ;;  %v3450_v1 = vpop.permute.xlu0 %336  ;;  %v3467_v11 = vrot.slane %v98_v31, %v1133_v62 }
  0xe3   :  { %4347 = vst [vmem:[#allocation35_spill] sm:$0xff] %v3450_v1  ;;  %v795_v1 = vmul.f32 %v3459_v10, %v3254_v50  ;;  %v472_v50 = vmul.f32 %v3457_v56, %v3233_v43 }
  0xe4   :  { %644 = vperm.xlu1 %2784, %v3112_v20   ;;  %v1183_v59 = vmul.f32 %v3467_v11, %v3342_v33 }
  0xe5   :  { %960 = vperm.xlu0 %2806, %v3077_v14   ;;  %v3461_v12 = vpop.permute.xlu1 %628  ;;  %v471_v14 = vmul.f32 %v3457_v56, %v3224_v40 }
  0xe6   :  { %4348 = vst [vmem:[#allocation36_spill] sm:$0xff] %v3461_v12 }
  0xe7   :  { %v3463_v4 = vpop.permute.xlu0 %552  ;;  %v859_v62 = vadd.f32 %v795_v1, %v471_v14 }
  0xe8   :  { %2785 = vset.pattern.permute.xlu1 %v4335_v39 }
  0xe9   :  { %892 = vperm.xlu0 %2806, %v3231_v42   ;;  %968 = vperm.xlu1 %2785, %v3250_v48   ;;  %v1184_v42 = vmul.f32 %v3467_v11, %v3352_v18  ;;  %v1247_v33 = vadd.f32 %v1183_v59, %v859_v62 }
  0xea   :  { %v3476_v8 = vpop.permute.xlu1 %952 }
  0xeb   :  { %v685_v7 = vpop.permute.xlu0 %684  ;;  %4349 = vst [vmem:[#allocation37_spill] sm:$0xff] %v3476_v8  ;;  %v1311_v43 = vmax.f32 %v1247_v33, 0.0 }
  0xec   :  { %v796_v31 = vmul.f32 %v3459_v10, %v685_v7 }
  0xed   :  { %1020 = vperm.xlu0 %2806, %v3272_v54   ;;  %1092 = vperm.xlu1 %2785, %v3390_v26  }
  0xee   :  { %v860_v40 = vadd.f32 %v796_v31, %v472_v50  ;;  %v3487_v48 = vpop.permute.xlu1 %1076 }
  0xef   :  { %v3485_v12 = vpop.permute.xlu0 %488 }
  0xf0   :  { %v1248_v8 = vadd.f32 %v1184_v42, %v860_v40 }
  0xf1   :  { %964 = vperm.xlu0 %2806, %v3091_v16   ;;  %900 = vperm.xlu1 %2785, %v3106_v19  }
  0xf2   :  { %v1312_v1 = vmax.f32 %v1248_v8, 0.0  ;;  %v3493_v54 = vpop.permute.xlu1 %884 }
  0xf3   :  { %v3491_v14 = vpop.permute.xlu0 %620 }
  0xf4   :  { %v1367_v18 = vpack.c.bf16 %v1312_v1, %v1311_v43 }
  0xf5   :  { %1096 = vperm.xlu0 %2806, %v3098_v17   ;;  %1028 = vperm.xlu1 %2785, %v72_v9   ;;  %v90_v17 = vld [vmem:[%s4286_s0 + $0x1c0] sm:$0xff] }
  0xf6   :  { %2634 = vmatprep.subr.bf16.mxu1 %v1367_v18  ;;  %v3498_v59 = vpop.permute.xlu1 %1012 }
  0xf7   :  { %v3496_v26 = vpop.permute.xlu0 %564 }
  0xf9   :  { %904 = vperm.xlu0 %2806, %v3260_v51   ;;  %2786 = vset.pattern.permute.xlu1 %v4329_v30 }
  0xfa   :  { %221 = vperm.xlu1 %2786, %v3277_v55  }
  0xfb   :  { %v3502_v16 = vpop.permute.xlu0 %500  ;;  %v3505_v19 = vpop.permute.xlu1 %201 }
  0xfd   :  { %1032 = vperm.xlu0 %2806, %v3112_v20   ;;  %v74_v20 = vld [vmem:[%s4286_s0 + $0x140] sm:$0xff] }
  0xfe   :  { %381 = vperm.xlu1 %2786, %v90_v17  }
  0xff   :  { %v3511_v9 = vpop.permute.xlu0 %568  ;;  %v3513_v7 = vpop.permute.xlu1 %361 }
 0x101   :  { %976 = vperm.xlu0 %2806, %v3119_v21  }
 0x102   :  { %386 = vperm.xlu1 %2786, %v3288_v58  }
 0x103   :  { %v3517_v51 = vpop.permute.xlu0 %700  ;;  %v3519_v8 = vpop.permute.xlu1 %366 }
 0x105   :  { %908 = vperm.xlu0 %2806, %v3298_v61  }
 0x106   :  { %2787 = vset.pattern.permute.xlu1 %v4333_v45 }
 0x107   :  { %v3523_v50 = vpop.permute.xlu0 %504  ;;  %588 = vperm.xlu1 %2787, %v3119_v21  }
 0x108   :  { %v3529_v62 = vpop.permute.xlu1 %572 }
 0x109   :  { %1036 = vperm.xlu0 %2806, %v74_v20  }
 0x10b   :  { %v3531_v31 = vpop.permute.xlu0 %636  ;;  %712 = vperm.xlu1 %2787, %v90_v17  }
 0x10c   :  { %v3533_v42 = vpop.permute.xlu1 %696 }
 0x10d   :  { %980 = vperm.xlu0 %2806, %v3132_v23  }
 0x10f   :  { %v3536_v40 = vpop.permute.xlu0 %580  ;;  %2788 = vset.pattern.permute.xlu1 %v4329_v30 }
 0x110   :  { %4350 = vst [vmem:[#allocation38_spill] sm:$0xff] %v3536_v40  ;;  %141 = vperm.xlu1 %2788, %v3298_v61  }
 0x111   :  { %1112 = vperm.xlu0 %2806, %v3142_v25   ;;  %v3541_v21 = vpop.permute.xlu1 %121 }
 0x113   :  { %v3543_v33 = vpop.permute.xlu0 %516 }
 0x114   :  { %4351 = vst [vmem:[#allocation39_spill] sm:$0xff] %v3543_v33  ;;  %301 = vperm.xlu1 %2788, %v74_v20  }
 0x115   :  { %920 = vperm.xlu0 %2806, %v3330_v13   ;;  %v3546_v43 = vpop.permute.xlu1 %281 }
 0x116   :  { %4352 = vst [vmem:[#allocation40_spill] sm:$0xff] %v3546_v43 }
 0x117   :  { %v3548_v1 = vpop.permute.xlu0 %584 }
 0x118   :  { %4353 = vst [vmem:[#allocation41_spill] sm:$0xff] %v3548_v1  ;;  %306 = vperm.xlu1 %2788, %v3310_v0   ;;  %v3567_v1 = vld [vmem:[%s4286_s0 + $0x160] sm:$0xff] }
 0x119   :  { %1048 = vperm.xlu0 %2806, %v3158_v28   ;;  %v3552_v18 = vpop.permute.xlu1 %286  ;;  %4356 = vst [vmem:[#allocation44_spill] sm:$0xff] %v3567_v1 }
 0x11b   :  { %v3554_v61 = vpop.permute.xlu0 %716 }
 0x11c   :  { %4354 = vst [vmem:[#allocation42_spill] sm:$0xff] %v3554_v61  ;;  %2789 = vset.pattern.permute.xlu1 %v4333_v45 }
 0x11d   :  { %992 = vperm.xlu0 %2806, %v3165_v29   ;;  %524 = vperm.xlu1 %2789, %v3125_v22  }
 0x11e   :  { %v3559_v33 = vpop.permute.xlu1 %508 }
 0x11f   :  { %v3561_v40 = vpop.permute.xlu0 %520 }
 0x120   :  { %4355 = vst [vmem:[#allocation43_spill] sm:$0xff] %v3561_v40 }
 0x121   :  { %924 = vperm.xlu0 %2806, %v3361_v6   ;;  %648 = vperm.xlu1 %2789, %v74_v20  }
 0x122   :  { %v3569_v43 = vpop.permute.xlu1 %632 }
 0x123   :  { %v3571_v61 = vpop.permute.xlu0 %652 }
 0x124   :  { %4357 = vst [vmem:[#allocation45_spill] sm:$0xff] %v3571_v61 }
 0x125   :  { %1052 = vperm.xlu0 %2806, %v3567_v1   ;;  %2790 = vset.pattern.permute.xlu1 %v4335_v39 }
 0x126   :  { %972 = vperm.xlu1 %2790, %v3277_v55  }
 0x127   :  { %v3576_v29 = vpop.permute.xlu0 %596  ;;  %v3578_v40 = vpop.permute.xlu1 %956 }
 0x128   :  { %4358 = vst [vmem:[#allocation46_spill] sm:$0xff] %v3576_v29 }
 0x129   :  { %996 = vperm.xlu0 %2806, %v3180_v32  }
 0x12a   :  { %1100 = vperm.xlu1 %2790, %v90_v17  }
 0x12b   :  { %v3581_v20 = vpop.permute.xlu0 %532  ;;  %v3583_v6 = vpop.permute.xlu1 %1084 }
 0x12c   :  { %4359 = vst [vmem:[#allocation47_spill] sm:$0xff] %v3581_v20  ;;  %v440_v20 = vmul.f32 %v3457_v56, %v3235_v44  ;;  %v747_v44 = vmul.f32 %v3459_v10, %v3485_v12 }
 0x12d   :  { %1128 = vperm.xlu0 %2806, %v3191_v34  }
 0x12e   :  { %1104 = vperm.xlu1 %2790, %v3288_v58  }
 0x12f   :  { %v3587_v61 = vpop.permute.xlu0 %600  ;;  %v3589_v1 = vpop.permute.xlu1 %1088 }
 0x130   :  { %4360 = vst [vmem:[#allocation48_spill] sm:$0xff] %v3587_v61 }
 0x131   :  { %936 = vperm.xlu0 %2806, %v3395_v15  }
 0x132   :  { %912 = vperm.xlu1 %2790, %v3125_v22   ;;  %v3612_v22 = vld [vmem:[%s4286_s0 + $0x1d0] sm:$0xff] }
 0x133   :  { %v3593_v55 = vpop.permute.xlu0 %732  ;;  %v3595_v32 = vpop.permute.xlu1 %896  ;;  %4364 = vst [vmem:[#allocation52_spill] sm:$0xff] %v3612_v22 }
 0x134   :  { %4361 = vst [vmem:[#allocation49_spill] sm:$0xff] %v3593_v55  ;;  %v763_v55 = vmul.f32 %v3459_v10, %v3463_v4  ;;  %v748_v4 = vmul.f32 %v3459_v10, %v3305_v63  ;;  %v423_v63 = vmul.f32 %v3457_v56, %v3267_v53 }
 0x135   :  { %1064 = vperm.xlu0 %2806, %v3202_v36  }
 0x136   :  { %1040 = vperm.xlu1 %2790, %v3310_v0   ;;  %v439_v0 = vmul.f32 %v3457_v56, %v3226_v41  ;;  %v424_v41 = vmul.f32 %v3457_v56, %v3243_v46  ;;  %v780_v46 = vmul.f32 %v3459_v10, %v3491_v14 }
 0x137   :  { %v3599_v17 = vpop.permute.xlu0 %536  ;;  %v3601_v34 = vpop.permute.xlu1 %1024 }
 0x138   :  { %4362 = vst [vmem:[#allocation50_spill] sm:$0xff] %v3599_v17  ;;  %v827_v61 = vadd.f32 %v763_v55, %v439_v0  ;;  %v1136_v0 = vmul.f32 %v3467_v11, %v3363_v2  ;;  %v456_v2 = vmul.f32 %v3457_v56, %v3293_v60  ;;  %v455_v60 = vmul.f32 %v3457_v56, %v3283_v57 }
 0x13a   :  { %2791 = vset.pattern.permute.xlu1 %v4329_v30 }
 0x13b   :  { %v3604_v58 = vpop.permute.xlu0 %668  ;;  %236 = vperm.xlu1 %2791, %v3321_v5  }
 0x13c   :  { %4363 = vst [vmem:[#allocation51_spill] sm:$0xff] %v3604_v58  ;;  %v3607_v15 = vpop.permute.xlu1 %216 }
 0x13f   :  { %v3614_v36 = vpop.permute.xlu0 %612  ;;  %391 = vperm.xlu1 %2791, %v3612_v22  }
 0x140   :  { %4365 = vst [vmem:[#allocation53_spill] sm:$0xff] %v3614_v36  ;;  %v3621_v58 = vpop.permute.xlu1 %371  ;;  %v764_v36 = vmul.f32 %v3459_v10, %v3245_v47 }
 0x141   :  { %4366 = vst [vmem:[#allocation54_spill] sm:$0xff] %v3621_v58 }
 0x143   :  { %v3623_v17 = vpop.permute.xlu0 %548  ;;  %2792 = vset.pattern.permute.xlu1 %v4333_v45 }
 0x144   :  { %4367 = vst [vmem:[#allocation55_spill] sm:$0xff] %v3623_v17  ;;  %592 = vperm.xlu1 %2792, %v3132_v23   ;;  %v1151_v17 = vmul.f32 %v3467_v11, %v3332_v24  ;;  %v828_v23 = vadd.f32 %v764_v36, %v440_v20  ;;  %v812_v24 = vadd.f32 %v748_v4, %v424_v41 }
 0x145   :  { %v3637_v55 = vpop.permute.xlu1 %576 }
 0x146   :  { %4368 = vst [vmem:[#allocation56_spill] sm:$0xff] %v3637_v55  ;;  %v1215_v29 = vadd.f32 %v1151_v17, %v827_v61  ;;  %v779_v61 = vmul.f32 %v3459_v10, %v3316_v3  ;;  %v1200_v20 = vadd.f32 %v1136_v0, %v812_v24  ;;  %v811_v17 = vadd.f32 %v747_v44, %v423_v63 }
 0x147   :  { %v1168_v3 = vmul.f32 %v3467_v11, %v3373_v37 }
 0x148   :  { %v945_v47 = vpop.permute.xlu0 %944  ;;  %720 = vperm.xlu1 %2792, %v3612_v22   ;;  %v1279_v36 = vmax.f32 %v1215_v29, 0.0  ;;  %v766_v22 = vmul.f32 %v3459_v10, %v3496_v26  ;;  %v442_v29 = vmul.f32 %v3457_v56, %v3385_v35  ;;  %v441_v26 = vmul.f32 %v3457_v56, %v3252_v49 }
 0x149   :  { %v1152_v58 = vmul.f32 %v3467_v11, %v945_v47  ;;  %v3649_v55 = vpop.permute.xlu1 %704  ;;  %v844_v47 = vadd.f32 %v780_v46, %v456_v2  ;;  %v843_v44 = vadd.f32 %v779_v61, %v455_v60  ;;  %v1264_v46 = vmax.f32 %v1200_v20, 0.0  ;;  %v4369_v2 = vld [vmem:[#allocation26_spill] sm:$0xff] }
 0x14a   :  { %v830_v57 = vadd.f32 %v766_v22, %v442_v29  ;;  %v474_v35 = vmul.f32 %v3457_v56, %v3263_v52  ;;  %v797_v49 = vmul.f32 %v3459_v10, %v3414_v38  ;;  %v4371_v52 = vld [vmem:[#allocation22_spill] sm:$0xff] }
 0x14b   :  { %v1216_v12 = vadd.f32 %v1152_v58, %v828_v23  ;;  %v1232_v37 = vadd.f32 %v1168_v3, %v844_v47  ;;  %v473_v38 = vmul.f32 %v3457_v56, %v4371_v52  ;;  %v4372_v29 = vld [vmem:[#allocation6_spill] sm:$0xff] }
 0x14c   :  { %v877_v14 = vpop.permute.xlu0 %876  ;;  %724 = vperm.xlu1 %2792, %v3142_v25   ;;  %v765_v25 = vmul.f32 %v3459_v10, %v3408_v27  ;;  %v798_v27 = vmul.f32 %v3459_v10, %v4369_v2  ;;  %v4376_v2 = vld [vmem:[#allocation30_spill] sm:$0xff] }
 0x14d   :  { %v1135_v53 = vmul.f32 %v3467_v11, %v877_v14  ;;  %v1280_v41 = vmax.f32 %v1216_v12, 0.0  ;;  %v3661_v58 = vpop.permute.xlu1 %708  ;;  %v4370_v12 = vld [vmem:[#allocation37_spill] sm:$0xff]  ;;  %v3687_v14 = vld [vmem:[%s4286_s0 + $0x150] sm:$0xff]  ;;  %v1296_v3 = vmax.f32 %v1232_v37, 0.0 }
 0x14e   :  { %v1154_v22 = vmul.f32 %v3467_v11, %v4370_v12  ;;  %v457_v12 = vmul.f32 %v3457_v56, %v4376_v2 }
 0x14f   :  { %v1199_v4 = vadd.f32 %v1135_v53, %v811_v17  ;;  %v1351_v0 = vpack.c.bf16 %v1280_v41, %v1279_v36  ;;  %v829_v36 = vadd.f32 %v765_v25, %v441_v26 }
 0x150   :  { %v1005_v23 = vpop.permute.xlu0 %1004  ;;  %2793 = vset.pattern.permute.xlu1 %v4329_v30  ;;  %v1218_v53 = vadd.f32 %v1154_v22, %v830_v57  ;;  %v862_v57 = vadd.f32 %v798_v27, %v474_v35  ;;  %v4377_v22 = vld [vmem:[#allocation34_spill] sm:$0xff] }
 0x151   :  { %v1263_v63 = vmax.f32 %v1199_v4, 0.0  ;;  %v1167_v24 = vmul.f32 %v3467_v11, %v1005_v23  ;;  %2594 = vmatprep.subr.bf16.mxu0 %v1351_v0  ;;  %156 = vperm.xlu1 %2793, %v3330_v13   ;;  %v1185_v13 = vmul.f32 %v3467_v11, %v3487_v48  ;;  %v425_v4 = vmul.f32 %v3457_v56, %v4372_v29  ;;  %v4373_v0 = vld [vmem:[#allocation7_spill] sm:$0xff]  ;;  %v4375_v48 = vld [vmem:[#allocation8_spill] sm:$0xff] }
 0x152   :  { %v3682_v20 = vpop.permute.xlu1 %136  ;;  %v861_v23 = vadd.f32 %v797_v49, %v473_v38  ;;  %v3703_v25 = vmul.f32 %v3457_v56, %v4375_v48  ;;  %v781_v49 = vmul.f32 %v3459_v10, %v4377_v22  ;;  %v1282_v38 = vmax.f32 %v1218_v53, 0.0 }
 0x153   :  { %v1231_v61 = vadd.f32 %v1167_v24, %v843_v44  ;;  %v1343_v17 = vpack.c.bf16 %v1264_v46, %v1263_v63  ;;  %v458_v44 = vmul.f32 %v3457_v56, %v4373_v0  ;;  %v4374_v46 = vld [vmem:[#allocation32_spill] sm:$0xff]  ;;  %v4380_v0 = vld [vmem:[#allocation5_spill] sm:$0xff] }
 0x154   :  { %v949_v47 = vpop.permute.xlu0 %948  ;;  %v749_v26 = vmul.f32 %v3459_v10, %v4374_v46 }
 0x155   :  { %v1295_v41 = vmax.f32 %v1231_v61, 0.0  ;;  %v1153_v60 = vmul.f32 %v3467_v11, %v949_v47  ;;  %2595 = vmatpush3.bf16.msra.mxu0 %v1343_v17  ;;  %311 = vperm.xlu1 %2793, %v3687_v14   ;;  %v1249_v61 = vadd.f32 %v1185_v13, %v861_v23  ;;  %v1137_v17 = vmul.f32 %v3467_v11, %v3493_v54  ;;  %v4379_v54 = vld [vmem:[#allocation28_spill] sm:$0xff] }
 0x156   :  { %v3705_v24 = vpop.permute.xlu1 %291  ;;  %v750_v47 = vmul.f32 %v3459_v10, %v3502_v16  ;;  %v476_v13 = vmul.f32 %v3457_v56, %v3519_v8  ;;  %v426_v53 = vmul.f32 %v3457_v56, %v4379_v54  ;;  %v1169_v16 = vmul.f32 %v3467_v11, %v3498_v59 }
 0x157   :  { %v1217_v63 = vadd.f32 %v1153_v60, %v829_v36  ;;  %v1359_v37 = vpack.c.bf16 %v1296_v3, %v1295_v41  ;;  %v813_v36 = vadd.f32 %v749_v26, %v425_v4  ;;  %v4378_v41 = vld [vmem:[#allocation36_spill] sm:$0xff]  ;;  %v800_v3 = vmul.f32 %v3459_v10, %v3517_v51 }
 0x158   :  { %v1081_v52 = vpop.permute.xlu0 %1080  ;;  %v782_v60 = vmul.f32 %v3459_v10, %v4378_v41  ;;  %v845_v23 = vadd.f32 %v781_v49, %v457_v12  ;;  %v799_v51 = vmul.f32 %v3459_v10, %v3533_v42  ;;  %v1188_v8 = vmul.f32 %v3467_v11, %v3589_v1  ;;  %v4381_v41 = vld [vmem:[#allocation9_spill] sm:$0xff] }
 0x159   :  { %v1281_v35 = vmax.f32 %v1217_v63, 0.0  ;;  %v1186_v27 = vmul.f32 %v3467_v11, %v1081_v52  ;;  %2635 = vmatpush3.bf16.msra.mxu1 %v1359_v37  ;;  %2794 = vset.pattern.permute.xlu1 %v4333_v45  ;;  %v1201_v46 = vadd.f32 %v1137_v17, %v813_v36  ;;  %v1313_v63 = vmax.f32 %v1249_v61, 0.0 }
 0x15a   :  { %528 = vperm.xlu1 %2794, %v4380_v0   ;;  %v814_v37 = vadd.f32 %v750_v47, %v426_v53  ;;  %v475_v12 = vmul.f32 %v3457_v56, %v3513_v7  ;;  %v864_v22 = vadd.f32 %v800_v3, %v476_v13  ;;  %v1187_v42 = vmul.f32 %v3467_v11, %v3583_v6 }
 0x15b   :  { %v1250_v29 = vadd.f32 %v1186_v27, %v862_v57  ;;  %v1352_v4 = vpack.c.bf16 %v1282_v38, %v1281_v35  ;;  %v3732_v48 = vpop.permute.xlu1 %512  ;;  %v846_v57 = vadd.f32 %v782_v60, %v458_v44  ;;  %v1233_v49 = vadd.f32 %v1169_v16, %v845_v23 }
 0x15c   :  { %v889_v26 = vpop.permute.xlu0 %888  ;;  %v767_v1 = vmul.f32 %v3459_v10, %v3511_v9  ;;  %v1265_v52 = vmax.f32 %v1201_v46, 0.0  ;;  %v768_v38 = vmul.f32 %v3459_v10, %v3529_v62  ;;  %v863_v44 = vadd.f32 %v799_v51, %v475_v12 }
 0x15d   :  { %v1314_v2 = vmax.f32 %v1250_v29, 0.0  ;;  %v1138_v59 = vmul.f32 %v3467_v11, %v889_v26  ;;  %2596 = vmatprep.subr.bf16.mxu0 %v1352_v4  ;;  %v1252_v47 = vadd.f32 %v1188_v8, %v864_v22  ;;  %v443_v6 = vmul.f32 %v3457_v56, %v3505_v19 }
 0x15e   :  { %656 = vperm.xlu1 %2794, %v3687_v14   ;;  %v1155_v27 = vmul.f32 %v3467_v11, %v3578_v40  ;;  %v428_v60 = vmul.f32 %v3457_v56, %v4381_v41  ;;  %v752_v62 = vmul.f32 %v3459_v10, %v3559_v33  ;;  %v1251_v3 = vadd.f32 %v1187_v42, %v863_v44 }
 0x15f   :  { %v1202_v17 = vadd.f32 %v1138_v59, %v814_v37  ;;  %v1368_v61 = vpack.c.bf16 %v1314_v2, %v1313_v63  ;;  %v3744_v7 = vpop.permute.xlu1 %640  ;;  %v1297_v13 = vmax.f32 %v1233_v49, 0.0  ;;  %v831_v54 = vadd.f32 %v767_v1, %v443_v6  ;;  %v4382_v1 = vld [vmem:[#allocation40_spill] sm:$0xff] }
 0x160   :  { %v1017_v35 = vpop.permute.xlu0 %1016  ;;  %v751_v40 = vmul.f32 %v3459_v10, %v3523_v50  ;;  %v832_v16 = vadd.f32 %v768_v38, %v3703_v25  ;;  %v1316_v29 = vmax.f32 %v1252_v47, 0.0  ;;  %v1140_v4 = vmul.f32 %v3467_v11, %v3595_v32 }
 0x161   :  { %v1266_v9 = vmax.f32 %v1202_v17, 0.0  ;;  %v1170_v36 = vmul.f32 %v3467_v11, %v1017_v35  ;;  %2636 = vmatprep.subr.bf16.mxu1 %v1368_v61  ;;  %v427_v33 = vmul.f32 %v3457_v56, %v3541_v21  ;;  %v1219_v51 = vadd.f32 %v1155_v27, %v831_v54  ;;  %v4384_v27 = vld [vmem:[#allocation52_spill] sm:$0xff] }
 0x162   :  { %660 = vperm.xlu1 %2794, %v3158_v28   ;;  %v784_v50 = vmul.f32 %v3459_v10, %v3531_v31  ;;  %v460_v25 = vmul.f32 %v3457_v56, %v3552_v18  ;;  %v816_v26 = vadd.f32 %v752_v62, %v428_v60  ;;  %v1315_v63 = vmax.f32 %v1251_v3, 0.0 }
 0x163   :  { %v1234_v53 = vadd.f32 %v1170_v36, %v846_v57  ;;  %v1344_v19 = vpack.c.bf16 %v1266_v9, %v1265_v52  ;;  %v3761_v46 = vpop.permute.xlu1 %644  ;;  %v783_v21 = vmul.f32 %v3459_v10, %v3569_v43  ;;  %v1172_v59 = vmul.f32 %v3467_v11, %v3601_v34  ;;  %v4383_v43 = vld [vmem:[#allocation38_spill] sm:$0xff]  ;;  %v4385_v9 = vld [vmem:[#allocation56_spill] sm:$0xff] }
 0x164   :  { %v961_v23 = vpop.permute.xlu0 %960  ;;  %v1204_v2 = vadd.f32 %v1140_v4, %v816_v26  ;;  %v1369_v31 = vpack.c.bf16 %v1316_v29, %v1315_v63  ;;  %v815_v12 = vadd.f32 %v751_v40, %v427_v33  ;;  %v1283_v22 = vmax.f32 %v1219_v51, 0.0  ;;  %v4387_v29 = vld [vmem:[#allocation54_spill] sm:$0xff]  ;;  %v4388_v26 = vld [vmem:[#allocation11_spill] sm:$0xff] }
 0x165   :  { %v1298_v8 = vmax.f32 %v1234_v53, 0.0  ;;  %v1156_v28 = vmul.f32 %v3467_v11, %v961_v23  ;;  %2597 = vmatpush3.bf16.msra.mxu0 %v1344_v19  ;;  %v459_v17 = vmul.f32 %v3457_v56, %v4382_v1  ;;  %v848_v61 = vadd.f32 %v784_v50, %v460_v25 }
 0x166   :  { %2795 = vset.pattern.permute.xlu1 %v4335_v39  ;;  %v770_v52 = vmul.f32 %v3459_v10, %v4383_v43  ;;  %v446_v34 = vmul.f32 %v3457_v56, %v3607_v15  ;;  %v1268_v47 = vmax.f32 %v1204_v2, 0.0  ;;  %v769_v36 = vmul.f32 %v3459_v10, %v4385_v9  ;;  %v4392_v9 = vld [vmem:[#allocation15_spill] sm:$0xff] }
 0x167   :  { %v1220_v32 = vadd.f32 %v1156_v28, %v832_v16  ;;  %v1360_v37 = vpack.c.bf16 %v1298_v8, %v1297_v13  ;;  %984 = vperm.xlu1 %2795, %v3321_v5   ;;  %v847_v44 = vadd.f32 %v783_v21, %v459_v17  ;;  %v1236_v35 = vadd.f32 %v1172_v59, %v848_v61  ;;  %v4386_v13 = vld [vmem:[#allocation10_spill] sm:$0xff] }
 0x168   :  { %v893_v57 = vpop.permute.xlu0 %892  ;;  %v969_v49 = vpop.permute.xlu1 %968  ;;  %v801_v15 = vmul.f32 %v3459_v10, %v3649_v55  ;;  %v445_v54 = vmul.f32 %v3457_v56, %v4386_v13  ;;  %v834_v53 = vadd.f32 %v770_v52, %v446_v34  ;;  %v477_v4 = vmul.f32 %v3457_v56, %v4387_v29 }
 0x169   :  { %v1284_v18 = vmax.f32 %v1220_v32, 0.0  ;;  %v1139_v42 = vmul.f32 %v3467_v11, %v893_v57  ;;  %2637 = vmatpush3.bf16.msra.mxu1 %v1360_v37  ;;  %v1158_v60 = vmul.f32 %v3467_v11, %v969_v49  ;;  %v1300_v16 = vmax.f32 %v1236_v35, 0.0  ;;  %v4389_v37 = vld [vmem:[#allocation13_spill] sm:$0xff] }
 0x16a   :  { %2638 = vmatprep.subr.bf16.mxu1 %v1369_v31  ;;  %v802_v23 = vmul.f32 %v3459_v10, %v3661_v58  ;;  %v833_v8 = vadd.f32 %v769_v36, %v445_v54  ;;  %v478_v63 = vmul.f32 %v3457_v56, %v4388_v26  ;;  %v865_v32 = vadd.f32 %v801_v15, %v477_v4 }
 0x16b   :  { %v1203_v5 = vadd.f32 %v1139_v42, %v815_v12  ;;  %v1353_v38 = vpack.c.bf16 %v1284_v18, %v1283_v22  ;;  %1108 = vperm.xlu1 %2795, %v4384_v27   ;;  %v1222_v55 = vadd.f32 %v1158_v60, %v834_v53  ;;  %v429_v21 = vmul.f32 %v3457_v56, %v4389_v37  ;;  %v4396_v37 = vld [vmem:[#allocation18_spill] sm:$0xff] }
 0x16c   :  { %v1021_v6 = vpop.permute.xlu0 %1020  ;;  %v1093_v3 = vpop.permute.xlu1 %1092  ;;  %v753_v58 = vmul.f32 %v3459_v10, %v3732_v48  ;;  %v866_v31 = vadd.f32 %v802_v23, %v478_v63  ;;  %v430_v12 = vmul.f32 %v3457_v56, %v3682_v20  ;;  %v785_v43 = vmul.f32 %v3459_v10, %v3744_v7  ;;  %v4391_v7 = vld [vmem:[#allocation12_spill] sm:$0xff] }
 0x16d   :  { %v1267_v41 = vmax.f32 %v1203_v5, 0.0  ;;  %v1171_v62 = vmul.f32 %v3467_v11, %v1021_v6  ;;  %2598 = vmatprep.subr.bf16.mxu0 %v1353_v38  ;;  %v1189_v33 = vmul.f32 %v3467_v11, %v1093_v3  ;;  %v1286_v42 = vmax.f32 %v1222_v55, 0.0  ;;  %v2916_v55 = vld [vmem:[%s4286_s0 + $0xe8] sm:$0xff]  ;;  %v4395_v63 = vld [vmem:[#allocation44_spill] sm:$0xff] }
 0x16e   :  { %v817_v61 = vadd.f32 %v753_v58, %v429_v21  ;;  %v461_v20 = vmul.f32 %v3457_v56, %v3705_v24  ;;  %v462_v36 = vmul.f32 %v3457_v56, %v4392_v9  ;;  %v2917_v58 = vld [vmem:[%s4286_s0 + $0x68] sm:$0xff] }
 0x16f   :  { %v1235_v19 = vadd.f32 %v1171_v62, %v847_v44  ;;  %v1345_v40 = vpack.c.bf16 %v1268_v47, %v1267_v41  ;;  %916 = vperm.xlu1 %2795, %v4380_v0   ;;  %v4390_v0 = vld [vmem:[#allocation39_spill] sm:$0xff]  ;;  %v1253_v22 = vadd.f32 %v1189_v33, %v865_v32  ;;  %v4393_v33 = vld [vmem:[#allocation14_spill] sm:$0xff] }
 0x170   :  { %v965_v51 = vpop.permute.xlu0 %964  ;;  %v901_v25 = vpop.permute.xlu1 %900  ;;  %v754_v57 = vmul.f32 %v3459_v10, %v4390_v0  ;;  %v849_v41 = vadd.f32 %v785_v43, %v461_v20 }
 0x171   :  { %v1299_v28 = vmax.f32 %v1235_v19, 0.0  ;;  %v1157_v50 = vmul.f32 %v3467_v11, %v965_v51  ;;  %2599 = vmatpush3.bf16.msra.mxu0 %v1345_v40  ;;  %v1141_v1 = vmul.f32 %v3467_v11, %v901_v25  ;;  %v1317_v38 = vmax.f32 %v1253_v22, 0.0  ;;  %v4394_v25 = vld [vmem:[#allocation16_spill] sm:$0xff]  ;;  %v4398_v22 = vld [vmem:[#allocation41_spill] sm:$0xff] }
 0x172   :  { %v818_v5 = vadd.f32 %v754_v57, %v430_v12  ;;  %v4397_v57 = vld [vmem:[#allocation17_spill] sm:$0xff] }
 0x173   :  { %v1221_v2 = vadd.f32 %v1157_v50, %v833_v8  ;;  %v1361_v59 = vpack.c.bf16 %v1300_v16, %v1299_v28  ;;  %1044 = vperm.xlu1 %2795, %v3687_v14   ;;  %v786_v14 = vmul.f32 %v3459_v10, %v3761_v46  ;;  %v1205_v47 = vadd.f32 %v1141_v1, %v817_v61  ;;  %v94_v46 = vld [vmem:[%s4286_s0 + $0x1e0] sm:$0xff] }
 0x174   :  { %v1097_v18 = vpop.permute.xlu0 %1096  ;;  %v1029_v48 = vpop.permute.xlu1 %1028 }
 0x175   :  { %v1285_v49 = vmax.f32 %v1221_v2, 0.0  ;;  %v1190_v17 = vmul.f32 %v3467_v11, %v1097_v18  ;;  %2639 = vmatpush3.bf16.msra.mxu1 %v1361_v59  ;;  %v1173_v6 = vmul.f32 %v3467_v11, %v1029_v48  ;;  %v850_v3 = vadd.f32 %v786_v14, %v462_v36  ;;  %v4400_v14 = vld [vmem:[#allocation43_spill] sm:$0xff] }
 0x176   :  { %v1269_v13 = vmax.f32 %v1205_v47, 0.0  ;;  %v771_v18 = vmul.f32 %v3459_v10, %v4398_v22 }
 0x177   :  { %v1254_v52 = vadd.f32 %v1190_v17, %v866_v31  ;;  %v1354_v34 = vpack.c.bf16 %v1286_v42, %v1285_v49  ;;  %2796 = vset.pattern.permute.xlu1 %v4329_v30  ;;  %v1237_v54 = vadd.f32 %v1173_v6, %v849_v41  ;;  %v448_v31 = vmul.f32 %v3457_v56, %v4397_v57 }
 0x178   :  { %v905_v44 = vpop.permute.xlu0 %904  ;;  %241 = vperm.xlu1 %2796, %v4391_v7  }
 0x179   :  { %v1318_v35 = vmax.f32 %v1254_v52, 0.0  ;;  %v1142_v27 = vmul.f32 %v3467_v11, %v905_v44  ;;  %2600 = vmatprep.subr.bf16.mxu0 %v1354_v34  ;;  %v222_v24 = vpop.permute.xlu1 %221  ;;  %v1301_v4 = vmax.f32 %v1237_v54, 0.0 }
 0x17a   :  { %v447_v42 = vmul.f32 %v3457_v56, %v222_v24 }
 0x17b   :  { %v1206_v60 = vadd.f32 %v1142_v27, %v818_v5  ;;  %v1370_v62 = vpack.c.bf16 %v1318_v35, %v1317_v38  ;;  %v4399_v5 = vld [vmem:[#allocation42_spill] sm:$0xff]  ;;  %v755_v38 = vmul.f32 %v3459_v10, %v4400_v14  ;;  %v2921_v14 = vld [vmem:[%s4286_s0 + $0x78] sm:$0xff] }
 0x17c   :  { %v1033_v15 = vpop.permute.xlu0 %1032  ;;  %401 = vperm.xlu1 %2796, %v94_v46   ;;  %v835_v48 = vadd.f32 %v771_v18, %v447_v42  ;;  %v804_v20 = vmul.f32 %v3459_v10, %v4399_v5  ;;  %v2918_v42 = vld [vmem:[%s4286_s0 + $0xf8] sm:$0xff] }
 0x17d   :  { %v1270_v53 = vmax.f32 %v1206_v60, 0.0  ;;  %v1174_v19 = vmul.f32 %v3467_v11, %v1033_v15  ;;  %2640 = vmatprep.subr.bf16.mxu1 %v1370_v62  ;;  %v382_v40 = vpop.permute.xlu1 %381  ;;  %v2920_v5 = vld [vmem:[%s4286_s0 + $0x1f8] sm:$0xff] }
 0x17e   :  { %v479_v44 = vmul.f32 %v3457_v56, %v382_v40  ;;  %v4401_v40 = vld [vmem:[#allocation19_spill] sm:$0xff] }
 0x17f   :  { %v1238_v16 = vadd.f32 %v1174_v19, %v850_v3  ;;  %v1346_v29 = vpack.c.bf16 %v1270_v53, %v1269_v13 }
 0x180   :  { %406 = vperm.xlu1 %2796, %v4393_v33   ;;  %v977_v0 = vpop.permute.xlu0 %976 }
 0x181   :  { %v1302_v23 = vmax.f32 %v1238_v16, 0.0  ;;  %2601 = vmatpush3.bf16.msra.mxu0 %v1346_v29  ;;  %v387_v51 = vpop.permute.xlu1 %386  ;;  %v1160_v1 = vmul.f32 %v3467_v11, %v977_v0  ;;  %v432_v16 = vmul.f32 %v3457_v56, %v4401_v40  ;;  %v4402_v29 = vld [vmem:[#allocation45_spill] sm:$0xff] }
 0x182   :  { %v480_v6 = vmul.f32 %v3457_v56, %v387_v51 }
 0x183   :  { %v1362_v8 = vpack.c.bf16 %v1302_v23, %v1301_v4  ;;  %v788_v4 = vmul.f32 %v3459_v10, %v4402_v29 }
 0x184   :  { %2797 = vset.pattern.permute.xlu1 %v4333_v45  ;;  %v868_v15 = vadd.f32 %v804_v20, %v480_v6 }
 0x185   :  { %2641 = vmatpush3.bf16.msra.mxu1 %v1362_v8  ;;  %604 = vperm.xlu1 %2797, %v2916_v55  }
 0x186   :  { %v589_v28 = vpop.permute.xlu1 %588 }
 0x187   :  { %v772_v59 = vmul.f32 %v3459_v10, %v589_v28 }
 0x189   :  { %728 = vperm.xlu1 %2797, %v94_v46   ;;  %v836_v49 = vadd.f32 %v772_v59, %v448_v31 }
 0x18a   :  { %v713_v50 = vpop.permute.xlu1 %712 }
 0x18b   :  { %v1224_v61 = vadd.f32 %v1160_v1, %v836_v49  ;;  %v803_v52 = vmul.f32 %v3459_v10, %v713_v50 }
 0x18d   :  { %2798 = vset.pattern.permute.xlu1 %v4329_v30  ;;  %v1288_v27 = vmax.f32 %v1224_v61, 0.0  ;;  %v867_v24 = vadd.f32 %v803_v52, %v479_v44  ;;  %v3897_v44 = vld [vmem:[%s4286_s0 + $0x170] sm:$0xff] }
 0x18e   :  { %161 = vperm.xlu1 %2798, %v4394_v25  }
 0x18f   :  { %v142_v26 = vpop.permute.xlu1 %141 }
 0x190   :  { %v431_v47 = vmul.f32 %v3457_v56, %v142_v26 }
 0x192   :  { %321 = vperm.xlu1 %2798, %v4395_v63   ;;  %v819_v41 = vadd.f32 %v755_v38, %v431_v47 }
 0x193   :  { %v302_v32 = vpop.permute.xlu1 %301 }
 0x194   :  { %v463_v23 = vmul.f32 %v3457_v56, %v302_v32 }
 0x196   :  { %326 = vperm.xlu1 %2798, %v4396_v37  }
 0x197   :  { %v307_v21 = vpop.permute.xlu1 %306 }
 0x198   :  { %v464_v8 = vmul.f32 %v3457_v56, %v307_v21 }
 0x19a   :  { %2799 = vset.pattern.permute.xlu1 %v4333_v45  ;;  %v852_v31 = vadd.f32 %v788_v4, %v464_v8 }
 0x19b   :  { %540 = vperm.xlu1 %2799, %v2917_v58  }
 0x19c   :  { %v525_v2 = vpop.permute.xlu1 %524 }
 0x19d   :  { %v756_v62 = vmul.f32 %v3459_v10, %v525_v2 }
 0x19f   :  { %664 = vperm.xlu1 %2799, %v4395_v63   ;;  %v820_v55 = vadd.f32 %v756_v62, %v432_v16 }
 0x1a0   :  { %v649_v12 = vpop.permute.xlu1 %648 }
 0x1a1   :  { %v787_v13 = vmul.f32 %v3459_v10, %v649_v12 }
 0x1a3   :  { %2800 = vset.pattern.permute.xlu1 %v4335_v39  ;;  %v851_v25 = vadd.f32 %v787_v13, %v463_v23  ;;  %v4404_v13 = vld [vmem:[#allocation21_spill] sm:$0xff] }
 0x1a4   :  { %988 = vperm.xlu1 %2800, %v4391_v7   ;;  %v909_v7 = vpop.permute.xlu0 %908 }
 0x1a5   :  { %v973_v17 = vpop.permute.xlu1 %972  ;;  %v1143_v60 = vmul.f32 %v3467_v11, %v909_v7 }
 0x1a6   :  { %v1159_v43 = vmul.f32 %v3467_v11, %v973_v17  ;;  %v96_v17 = vld [vmem:[%s4286_s0 + $0x1f0] sm:$0xff] }
 0x1a7   :  { %v1207_v51 = vadd.f32 %v1143_v60, %v819_v41 }
 0x1a8   :  { %v1223_v34 = vadd.f32 %v1159_v43, %v835_v48  ;;  %1116 = vperm.xlu1 %2800, %v94_v46   ;;  %v1037_v54 = vpop.permute.xlu0 %1036  ;;  %v2919_v43 = vld [vmem:[%s4286_s0 + $0xf0] sm:$0xff] }
 0x1a9   :  { %v1101_v35 = vpop.permute.xlu1 %1100  ;;  %v1175_v28 = vmul.f32 %v3467_v11, %v1037_v54  ;;  %v1271_v57 = vmax.f32 %v1207_v51, 0.0  ;;  %v482_v54 = vmul.f32 %v3457_v56, %v4404_v13 }
 0x1aa   :  { %v1287_v9 = vmax.f32 %v1223_v34, 0.0  ;;  %v1191_v36 = vmul.f32 %v3467_v11, %v1101_v35  ;;  %v2922_v35 = vld [vmem:[%s4286_s0 + $0x70] sm:$0xff] }
 0x1ac   :  { %1120 = vperm.xlu1 %2800, %v4393_v33   ;;  %v1355_v46 = vpack.c.bf16 %v1288_v27, %v1287_v9  ;;  %v1255_v53 = vadd.f32 %v1191_v36, %v867_v24  ;;  %v981_v27 = vpop.permute.xlu0 %980  ;;  %v4403_v36 = vld [vmem:[#allocation20_spill] sm:$0xff] }
 0x1ad   :  { %v1105_v3 = vpop.permute.xlu1 %1104  ;;  %v449_v24 = vmul.f32 %v3457_v56, %v4403_v36  ;;  %v1161_v62 = vmul.f32 %v3467_v11, %v981_v27 }
 0x1ae   :  { %v1192_v19 = vmul.f32 %v3467_v11, %v1105_v3  ;;  %2602 = vmatprep.subr.bf16.mxu0 %v1355_v46  ;;  %v1319_v26 = vmax.f32 %v1255_v53, 0.0  ;;  %v4405_v53 = vld [vmem:[#allocation46_spill] sm:$0xff] }
 0x1b0   :  { %v1256_v33 = vadd.f32 %v1192_v19, %v868_v15  ;;  %928 = vperm.xlu1 %2800, %v2917_v58   ;;  %v1239_v58 = vadd.f32 %v1175_v28, %v851_v25  ;;  %v1113_v46 = vpop.permute.xlu0 %1112  ;;  %v774_v19 = vmul.f32 %v3459_v10, %v4405_v53  ;;  %v4406_v28 = vld [vmem:[#allocation47_spill] sm:$0xff] }
 0x1b1   :  { %v913_v50 = vpop.permute.xlu1 %912  ;;  %v1194_v29 = vmul.f32 %v3467_v11, %v1113_v46 }
 0x1b2   :  { %v1320_v63 = vmax.f32 %v1256_v33, 0.0  ;;  %v1144_v2 = vmul.f32 %v3467_v11, %v913_v50  ;;  %v1303_v49 = vmax.f32 %v1239_v58, 0.0 }
 0x1b4   :  { %v1208_v59 = vadd.f32 %v1144_v2, %v820_v55  ;;  %1056 = vperm.xlu1 %2800, %v4396_v37   ;;  %v1371_v0 = vpack.c.bf16 %v1320_v63, %v1319_v26  ;;  %v921_v23 = vpop.permute.xlu0 %920 }
 0x1b5   :  { %v1041_v32 = vpop.permute.xlu1 %1040  ;;  %v1146_v25 = vmul.f32 %v3467_v11, %v921_v23 }
 0x1b6   :  { %v1272_v12 = vmax.f32 %v1208_v59, 0.0  ;;  %v1176_v21 = vmul.f32 %v3467_v11, %v1041_v32  ;;  %2642 = vmatprep.subr.bf16.mxu1 %v1371_v0 }
 0x1b8   :  { %v1240_v22 = vadd.f32 %v1176_v21, %v852_v31  ;;  %2801 = vset.pattern.permute.xlu1 %v4329_v30  ;;  %v1347_v18 = vpack.c.bf16 %v1272_v12, %v1271_v57  ;;  %v1049_v58 = vpop.permute.xlu0 %1048 }
 0x1b9   :  { %256 = vperm.xlu1 %2801, %v2918_v42  }
 0x1ba   :  { %v1304_v37 = vmax.f32 %v1240_v22, 0.0  ;;  %2603 = vmatpush3.bf16.msra.mxu0 %v1347_v18  ;;  %v237_v1 = vpop.permute.xlu1 %236  ;;  %v4407_v22 = vld [vmem:[#allocation23_spill] sm:$0xff] }
 0x1bb   :  { %v450_v15 = vmul.f32 %v3457_v56, %v237_v1  ;;  %v433_v18 = vmul.f32 %v3457_v56, %v4407_v22 }
 0x1bc   :  { %v1363_v48 = vpack.c.bf16 %v1304_v37, %v1303_v49 }
 0x1bd   :  { %411 = vperm.xlu1 %2801, %v96_v17   ;;  %v838_v51 = vadd.f32 %v774_v19, %v450_v15  ;;  %v2813_v15 = vld [vmem:[%s4288_s2 + $0xc] ss:$16 sps:$4 sm:$0xff]  }
 0x1be   :  { %2643 = vmatpush3.bf16.msra.mxu1 %v1363_v48  ;;  %v392_v61 = vpop.permute.xlu1 %391  ;;  %1552 = vmatprep.mubr.bf16.mxu1 %v2813_v15  ;;  %v4414_v15 = vld [vmem:[#allocation51_spill] sm:$0xff] }
 0x1bf   :  { %v481_v50 = vmul.f32 %v3457_v56, %v392_v61 }
 0x1c1   :  { %2802 = vset.pattern.permute.xlu1 %v4333_v45 }
 0x1c2   :  { %608 = vperm.xlu1 %2802, %v2919_v43   ;;  %v1178_v43 = vmul.f32 %v3467_v11, %v1049_v58 }
 0x1c3   :  { %v593_v52 = vpop.permute.xlu1 %592 }
 0x1c4   :  { %v773_v9 = vmul.f32 %v3459_v10, %v593_v52 }
 0x1c6   :  { %736 = vperm.xlu1 %2802, %v96_v17   ;;  %v837_v60 = vadd.f32 %v773_v9, %v449_v24 }
 0x1c7   :  { %v721_v34 = vpop.permute.xlu1 %720 }
 0x1c8   :  { %v1225_v40 = vadd.f32 %v1161_v62, %v837_v60  ;;  %v805_v8 = vmul.f32 %v3459_v10, %v721_v34  ;;  %v2810_v60 = vld [vmem:[%s4288_s2 + $0x4] ss:$16 sps:$4 sm:$0xff]  }
 0x1c9   :  { %1487 = vmatprep.mubr.bf16.mxu0 %v2810_v60 }
 0x1ca   :  { %740 = vperm.xlu1 %2802, %v2920_v5   ;;  %v1289_v63 = vmax.f32 %v1225_v40, 0.0  ;;  %v869_v32 = vadd.f32 %v805_v8, %v481_v50  ;;  %v4410_v50 = vld [vmem:[#allocation48_spill] sm:$0xff] }
 0x1cb   :  { %v725_v20 = vpop.permute.xlu1 %724 }
 0x1cc   :  { %v806_v3 = vmul.f32 %v3459_v10, %v725_v20 }
 0x1ce   :  { %2803 = vset.pattern.permute.xlu1 %v4329_v30  ;;  %v870_v16 = vadd.f32 %v806_v3, %v482_v54 }
 0x1cf   :  { %176 = vperm.xlu1 %2803, %v2921_v14  }
 0x1d0   :  { %v157_v38 = vpop.permute.xlu1 %156  ;;  %v1258_v2 = vadd.f32 %v1194_v29, %v870_v16 }
 0x1d1   :  { %v434_v4 = vmul.f32 %v3457_v56, %v157_v38 }
 0x1d3   :  { %331 = vperm.xlu1 %2803, %v3897_v44  }
 0x1d4   :  { %v312_v47 = vpop.permute.xlu1 %311 }
 0x1d5   :  { %v465_v38 = vmul.f32 %v3457_v56, %v312_v47 }
 0x1d7   :  { %2805 = vset.pattern.permute.xlu1 %v4333_v45  ;;  %v2923_v45 = vld [vmem:[%s4286_s0 + $0x178] sm:$0xff] }
 0x1d8   :  { %544 = vperm.xlu1 %2805, %v2922_v35  }
 0x1d9   :  { %v529_v6 = vpop.permute.xlu1 %528 }
 0x1da   :  { %v757_v0 = vmul.f32 %v3459_v10, %v529_v6 }
 0x1dc   :  { %672 = vperm.xlu1 %2805, %v3897_v44   ;;  %v821_v61 = vadd.f32 %v757_v0, %v433_v18 }
 0x1dd   :  { %v657_v7 = vpop.permute.xlu1 %656 }
 0x1de   :  { %v789_v34 = vmul.f32 %v3459_v10, %v657_v7 }
 0x1e0   :  { %676 = vperm.xlu1 %2805, %v2923_v45   ;;  %v853_v36 = vadd.f32 %v789_v34, %v465_v38 }
 0x1e1   :  { %v661_v41 = vpop.permute.xlu1 %660 }
 0x1e2   :  { %v790_v31 = vmul.f32 %v3459_v10, %v661_v41 }
 0x1e4   :  { %2807 = vset.pattern.permute.xlu1 %v4335_v39  ;;  %v758_v39 = vmul.f32 %v3459_v10, %v4406_v28 }
 0x1e5   :  { %1000 = vperm.xlu1 %2807, %v2918_v42   ;;  %v4408_v42 = vld [vmem:[#allocation24_spill] sm:$0xff] }
 0x1e6   :  { %v985_v33 = vpop.permute.xlu1 %984  ;;  %v822_v59 = vadd.f32 %v758_v39, %v434_v4  ;;  %v466_v49 = vmul.f32 %v3457_v56, %v4408_v42  ;;  %v993_v39 = vpop.permute.xlu0 %992 }
 0x1e7   :  { %v1162_v55 = vmul.f32 %v3467_v11, %v985_v33  ;;  %v4409_v33 = vld [vmem:[#allocation25_spill] sm:$0xff] }
 0x1e8   :  { %v1210_v48 = vadd.f32 %v1146_v25, %v822_v59  ;;  %v854_v5 = vadd.f32 %v790_v31, %v466_v49  ;;  %v775_v25 = vmul.f32 %v3459_v10, %v4410_v50  ;;  %v4411_v49 = vld [vmem:[#allocation50_spill] sm:$0xff] }
 0x1e9   :  { %v1226_v26 = vadd.f32 %v1162_v55, %v838_v51  ;;  %1124 = vperm.xlu1 %2807, %v96_v17   ;;  %v1322_v17 = vmax.f32 %v1258_v2, 0.0  ;;  %v452_v51 = vmul.f32 %v3457_v56, %v4409_v33 }
 0x1ea   :  { %v1109_v57 = vpop.permute.xlu1 %1108  ;;  %v1274_v27 = vmax.f32 %v1210_v48, 0.0  ;;  %v1242_v24 = vadd.f32 %v1178_v43, %v854_v5  ;;  %v925_v43 = vpop.permute.xlu0 %924 }
 0x1eb   :  { %v1290_v12 = vmax.f32 %v1226_v26, 0.0  ;;  %v1193_v21 = vmul.f32 %v3467_v11, %v1109_v57  ;;  %v1164_v26 = vmul.f32 %v3467_v11, %v993_v39 }
 0x1ec   :  { %v1306_v62 = vmax.f32 %v1242_v24, 0.0 }
 0x1ed   :  { %v1257_v37 = vadd.f32 %v1193_v21, %v869_v32  ;;  %932 = vperm.xlu1 %2807, %v2922_v35   ;;  %v1356_v1 = vpack.c.bf16 %v1290_v12, %v1289_v63 }
 0x1ee   :  { %v917_v52 = vpop.permute.xlu1 %916 }
 0x1ef   :  { %v1321_v20 = vmax.f32 %v1257_v37, 0.0  ;;  %v1145_v14 = vmul.f32 %v3467_v11, %v917_v52  ;;  %2604 = vmatprep.subr.bf16.mxu0 %v1356_v1  ;;  %v759_v37 = vmul.f32 %v3459_v10, %v4411_v49  ;;  %v4412_v1 = vld [vmem:[#allocation49_spill] sm:$0xff] }
 0x1f1   :  { %v1209_v6 = vadd.f32 %v1145_v14, %v821_v61  ;;  %1060 = vperm.xlu1 %2807, %v3897_v44   ;;  %v1372_v35 = vpack.c.bf16 %v1322_v17, %v1321_v20  ;;  %v808_v17 = vmul.f32 %v3459_v10, %v4412_v1  ;;  %v4416_v1 = vld [vmem:[#allocation31_spill] sm:$0xff] }
 0x1f2   :  { %v1045_v9 = vpop.permute.xlu1 %1044 }
 0x1f3   :  { %v1273_v46 = vmax.f32 %v1209_v6, 0.0  ;;  %v1177_v45 = vmul.f32 %v3467_v11, %v1045_v9  ;;  %2644 = vmatprep.subr.bf16.mxu1 %v1372_v35  ;;  %v4413_v35 = vld [vmem:[#allocation27_spill] sm:$0xff]  ;;  %v1147_v9 = vmul.f32 %v3467_v11, %v925_v43 }
 0x1f5   :  { %v1241_v7 = vadd.f32 %v1177_v45, %v853_v36  ;;  %v1348_v41 = vpack.c.bf16 %v1274_v27, %v1273_v46  ;;  %v436_v27 = vmul.f32 %v3457_v56, %v4413_v35  ;;  %v4418_v35 = vld [vmem:[#allocation55_spill] sm:$0xff] }
 0x1f7   :  { %v1305_v47 = vmax.f32 %v1241_v7, 0.0  ;;  %2605 = vmatpush3.bf16.msra.mxu0 %v1348_v41  ;;  %v242_v3 = vpop.permute.xlu1 %241 }
 0x1f8   :  { %v451_v55 = vmul.f32 %v3457_v56, %v242_v3 }
 0x1f9   :  { %v1364_v44 = vpack.c.bf16 %v1306_v62, %v1305_v47 }
 0x1fa   :  { %v839_v2 = vadd.f32 %v775_v25, %v451_v55 }
 0x1fb   :  { %2645 = vmatpush3.bf16.msra.mxu1 %v1364_v44  ;;  %v402_v13 = vpop.permute.xlu1 %401  ;;  %v1053_v44 = vpop.permute.xlu0 %1052 }
 0x1fc   :  { %v483_v31 = vmul.f32 %v3457_v56, %v402_v13  ;;  %v792_v13 = vmul.f32 %v3459_v10, %v4414_v15 }
 0x1ff   :  { %v407_v54 = vpop.permute.xlu1 %406 }
 0x200   :  { %v484_v21 = vmul.f32 %v3457_v56, %v407_v54  ;;  %v1179_v54 = vmul.f32 %v3467_v11, %v1053_v44 }
 0x202   :  { %v872_v20 = vadd.f32 %v808_v17, %v484_v21  ;;  %v486_v17 = vmul.f32 %v3457_v56, %v4416_v1  ;;  %v2820_v1 = vld [vmem:[%s4288_s2 + $0x44] ss:$16 sps:$4 sm:$0xff]  }
 0x204   :  { %v605_v53 = vpop.permute.xlu1 %604 }
 0x205   :  { %v776_v23 = vmul.f32 %v3459_v10, %v605_v53 }
 0x207   :  { %v840_v28 = vadd.f32 %v776_v23, %v452_v51 }
 0x208   :  { %v729_v19 = vpop.permute.xlu1 %728 }
 0x209   :  { %v1228_v59 = vadd.f32 %v1164_v26, %v840_v28  ;;  %v807_v57 = vmul.f32 %v3459_v10, %v729_v19 }
 0x20b   :  { %v1292_v22 = vmax.f32 %v1228_v59, 0.0  ;;  %v871_v48 = vadd.f32 %v807_v57, %v483_v31 }
 0x20d   :  { %v162_v40 = vpop.permute.xlu1 %161 }
 0x20e   :  { %v435_v58 = vmul.f32 %v3457_v56, %v162_v40 }
 0x210   :  { %v823_v52 = vadd.f32 %v759_v37, %v435_v58 }
 0x211   :  { %v322_v16 = vpop.permute.xlu1 %321 }
 0x212   :  { %v467_v36 = vmul.f32 %v3457_v56, %v322_v16  ;;  %v1211_v46 = vadd.f32 %v1147_v9, %v823_v52 }
 0x214   :  { %v1275_v40 = vmax.f32 %v1211_v46, 0.0 }
 0x215   :  { %v327_v29 = vpop.permute.xlu1 %326 }
 0x216   :  { %v468_v45 = vmul.f32 %v3457_v56, %v327_v29 }
 0x21a   :  { %v541_v4 = vpop.permute.xlu1 %540 }
 0x21b   :  { %v760_v34 = vmul.f32 %v3459_v10, %v541_v4  ;;  %v856_v4 = vadd.f32 %v792_v13, %v468_v45  ;;  %v4419_v13 = vld [vmem:[#allocation33_spill] sm:$0xff] }
 0x21d   :  { %v824_v7 = vadd.f32 %v760_v34, %v436_v27  ;;  %v762_v27 = vmul.f32 %v3459_v10, %v4418_v35  ;;  %v2835_v35 = vld [vmem:[%s4289_s3 + $0x18] sm:$0xff]  }
 0x21e   :  { %v665_v8 = vpop.permute.xlu1 %664 }
 0x21f   :  { %v791_v14 = vmul.f32 %v3459_v10, %v665_v8 }
 0x221   :  { %v855_v60 = vadd.f32 %v791_v14, %v467_v36 }
 0x223   :  { %v989_v63 = vpop.permute.xlu1 %988  ;;  %v1243_v23 = vadd.f32 %v1179_v54, %v855_v60  ;;  %v437_v54 = vmul.f32 %v3457_v56, %v4419_v13 }
 0x224   :  { %v1163_v0 = vmul.f32 %v3467_v11, %v989_v63 }
 0x225   :  { %v1307_v55 = vmax.f32 %v1243_v23, 0.0 }
 0x226   :  { %v1227_v32 = vadd.f32 %v1163_v0, %v839_v2 }
 0x227   :  { %v1117_v12 = vpop.permute.xlu1 %1116 }
 0x228   :  { %v1291_v18 = vmax.f32 %v1227_v32, 0.0  ;;  %v1195_v42 = vmul.f32 %v3467_v11, %v1117_v12  ;;  %v997_v32 = vpop.permute.xlu0 %996  ;;  %v4415_v12 = vld [vmem:[#allocation29_spill] sm:$0xff] }
 0x229   :  { %v453_v21 = vmul.f32 %v3457_v56, %v4415_v12 }
 0x22a   :  { %v1357_v61 = vpack.c.bf16 %v1292_v22, %v1291_v18  ;;  %v1259_v38 = vadd.f32 %v1195_v42, %v871_v48  ;;  %v1165_v48 = vmul.f32 %v3467_v11, %v997_v32 }
 0x22b   :  { %v1121_v5 = vpop.permute.xlu1 %1120 }
 0x22c   :  { %v1196_v6 = vmul.f32 %v3467_v11, %v1121_v5  ;;  %2606 = vmatprep.subr.bf16.mxu0 %v1357_v61  ;;  %v1323_v62 = vmax.f32 %v1259_v38, 0.0  ;;  %v1129_v18 = vpop.permute.xlu0 %1128  ;;  %v4417_v61 = vld [vmem:[#allocation53_spill] sm:$0xff] }
 0x22d   :  { %v778_v43 = vmul.f32 %v3459_v10, %v4417_v61  ;;  %v1198_v9 = vmul.f32 %v3467_v11, %v1129_v18  ;;  %v2822_v61 = vld [vmem:[%s4288_s2 + $0x40] ss:$16 sps:$4 sm:$0xff]  }
 0x22e   :  { %v1260_v24 = vadd.f32 %v1196_v6, %v872_v20 }
 0x22f   :  { %v929_v41 = vpop.permute.xlu1 %928 }
 0x230   :  { %v1324_v47 = vmax.f32 %v1260_v24, 0.0  ;;  %v1148_v3 = vmul.f32 %v3467_v11, %v929_v41  ;;  %v937_v36 = vpop.permute.xlu0 %936 }
 0x232   :  { %v1212_v53 = vadd.f32 %v1148_v3, %v824_v7  ;;  %v1373_v19 = vpack.c.bf16 %v1324_v47, %v1323_v62 }
 0x233   :  { %v1057_v16 = vpop.permute.xlu1 %1056 }
 0x234   :  { %v1276_v29 = vmax.f32 %v1212_v53, 0.0  ;;  %v1180_v33 = vmul.f32 %v3467_v11, %v1057_v16  ;;  %2646 = vmatprep.subr.bf16.mxu1 %v1373_v19  ;;  %v1150_v53 = vmul.f32 %v3467_v11, %v937_v36  ;;  %v4420_v19 = vld [vmem:[#allocation35_spill] sm:$0xff]  ;;  %v1065_v23 = vpop.permute.xlu0 %1064 }
 0x236   :  { %v1244_v51 = vadd.f32 %v1180_v33, %v856_v4  ;;  %v1349_v8 = vpack.c.bf16 %v1276_v29, %v1275_v40  ;;  %v470_v40 = vmul.f32 %v3457_v56, %v4420_v19 }
 0x238   :  { %v1308_v28 = vmax.f32 %v1244_v51, 0.0  ;;  %2607 = vmatpush3.bf16.msra.mxu0 %v1349_v8  ;;  %v257_v39 = vpop.permute.xlu1 %256 }
 0x239   :  { %v454_v37 = vmul.f32 %v3457_v56, %v257_v39 }
 0x23a   :  { %v1365_v50 = vpack.c.bf16 %v1308_v28, %v1307_v55 }
 0x23b   :  { %v842_v14 = vadd.f32 %v778_v43, %v454_v37  ;;  %v2816_v37 = vld [vmem:[%s4288_s2 + $0x20] ss:$16 sps:$4 sm:$0xff]   ;;  %v2826_v43 = vld [vmem:[%s4288_s2 + $0x64] ss:$16 sps:$4 sm:$0xff]  }
 0x23c   :  { %2647 = vmatpush3.bf16.msra.mxu1 %v1365_v50  ;;  %v412_v25 = vpop.permute.xlu1 %411 }
 0x23d   :  { %v485_v24 = vmul.f32 %v3457_v56, %v412_v25  ;;  %v1182_v25 = vmul.f32 %v3467_v11, %v1065_v23 }
 0x241   :  { %v609_v26 = vpop.permute.xlu1 %608 }
 0x242   :  { %v777_v58 = vmul.f32 %v3459_v10, %v609_v26 }
 0x244   :  { %v841_v42 = vadd.f32 %v777_v58, %v453_v21 }
 0x245   :  { %v737_v63 = vpop.permute.xlu1 %736 }
 0x246   :  { %v1229_v52 = vadd.f32 %v1165_v48, %v841_v42  ;;  %v809_v38 = vmul.f32 %v3459_v10, %v737_v63  ;;  %v2823_v48 = vld [vmem:[%s4288_s2 + $0x4c] ss:$16 sps:$4 sm:$0xff]  }
 0x248   :  { %v1293_v45 = vmax.f32 %v1229_v52, 0.0  ;;  %v873_v47 = vadd.f32 %v809_v38, %v485_v24  ;;  %v2825_v52 = vld [vmem:[%s4288_s2 + $0x48] ss:$16 sps:$4 sm:$0xff]  }
 0x249   :  { %v741_v2 = vpop.permute.xlu1 %740  ;;  %v2833_v38 = vld [vmem:[%s4289_s3 + $0x8] sm:$0xff]  }
 0x24a   :  { %v810_v49 = vmul.f32 %v3459_v10, %v741_v2 }
 0x24c   :  { %v874_v34 = vadd.f32 %v810_v49, %v486_v17  ;;  %v2817_v49 = vld [vmem:[%s4288_s2 + $0x2c] ss:$16 sps:$4 sm:$0xff]   ;;  %v2819_v17 = vld [vmem:[%s4288_s2 + $0x28] ss:$16 sps:$4 sm:$0xff]  }
 0x24e   :  { %v177_v59 = vpop.permute.xlu1 %176  ;;  %v1262_v7 = vadd.f32 %v1198_v9, %v874_v34  ;;  %v2829_v34 = vld [vmem:[%s4288_s2 + $0x6c] ss:$16 sps:$4 sm:$0xff]  }
 0x24f   :  { %v438_v5 = vmul.f32 %v3457_v56, %v177_v59 }
 0x250   :  { %v1326_v29 = vmax.f32 %v1262_v7, 0.0 }
 0x251   :  { %v826_v41 = vadd.f32 %v762_v27, %v438_v5  ;;  %v2828_v5 = vld [vmem:[%s4288_s2 + $0x60] ss:$16 sps:$4 sm:$0xff]  }
 0x252   :  { %v332_v0 = vpop.permute.xlu1 %331 }
 0x253   :  { %v1214_v33 = vadd.f32 %v1150_v53, %v826_v41  ;;  %v469_v26 = vmul.f32 %v3457_v56, %v332_v0  ;;  %v2814_v56 = vld [vmem:[%s4288_s2 + $0x24] ss:$16 sps:$4 sm:$0xff]  }
 0x255   :  { %v1278_v59 = vmax.f32 %v1214_v33, 0.0 }
 0x257   :  { %v545_v57 = vpop.permute.xlu1 %544 }
 0x258   :  { %v761_v60 = vmul.f32 %v3459_v10, %v545_v57 }
 0x25a   :  { %v825_v51 = vadd.f32 %v761_v60, %v437_v54 }
 0x25b   :  { %v673_v31 = vpop.permute.xlu1 %672 }
 0x25c   :  { %v793_v55 = vmul.f32 %v3459_v10, %v673_v31 }
 0x25e   :  { %v857_v32 = vadd.f32 %v793_v55, %v469_v26 }
 0x25f   :  { %v677_v22 = vpop.permute.xlu1 %676 }
 0x260   :  { %v794_v3 = vmul.f32 %v3459_v10, %v677_v22  ;;  %v2808_v22 = vld [vmem:[%s4288_s2] ss:$16 sps:$4 sm:$0xff]  }
 0x262   :  { %v858_v28 = vadd.f32 %v794_v3, %v470_v40 }
 0x264   :  { %v1001_v20 = vpop.permute.xlu1 %1000  ;;  %v1246_v58 = vadd.f32 %v1182_v25, %v858_v28 }
 0x265   :  { %v1166_v6 = vmul.f32 %v3467_v11, %v1001_v20  ;;  %v2831_v20 = vld [vmem:[%s4288_s2 + $0x68] ss:$16 sps:$4 sm:$0xff]  }
 0x266   :  { %v1310_v18 = vmax.f32 %v1246_v58, 0.0 }
 0x267   :  { %v1230_v46 = vadd.f32 %v1166_v6, %v842_v14  ;;  %v2832_v14 = vld [vmem:[%s4289_s3] sm:$0xff]   ;;  %v2834_v6 = vld [vmem:[%s4289_s3 + $0x10] sm:$0xff]   ;;  %s2492_s3 = sshll.u32 %s2953_s19, 4  ;;  %s2493_s3 = int_to_ptr.vmem [resolvable:$true] %s2492_s3 }
 0x268   :  { %v1125_v62 = vpop.permute.xlu1 %1124  ;;  %s2924_s20 = scalar_lea.vmem %s2493_s3, 32  ;;  %p2929_p1 = scmp.lt.s32.totalorder %s2493_s3, %s2493_s3 }
 0x269   :  { %v1294_v44 = vmax.f32 %v1230_v46, 0.0  ;;  %v1197_v15 = vmul.f32 %v3467_v11, %v1125_v62  ;;  %p2925_p0 = scmp.ne.s32.totalorder %s2493_s3, %s2924_s20  ;;  %p2930_p2 = scmp.lt.s32.totalorder %s2924_s20, %s2924_s20 }
 0x26b   :  { %v1261_v16 = vadd.f32 %v1197_v15, %v873_v47  ;;  %v1358_v4 = vpack.c.bf16 %v1294_v44, %v1293_v45  ;;  %p2931_p3 = por %p2930_p2, %p2929_p1 }
 0x26c   :  { %v933_v8 = vpop.permute.xlu1 %932 }
 0x26d   :  { %v1325_v39 = vmax.f32 %v1261_v16, 0.0  ;;  %v1149_v50 = vmul.f32 %v3467_v11, %v933_v8  ;;  %2608 = vmatprep.subr.bf16.mxu0 %v1358_v4  ;;  %p2932_p4 = pnand %p2931_p3, %p2925_p0 }
 0x26f   :  { %v1213_v63 = vadd.f32 %v1149_v50, %v825_v51  ;;  %v1374_v2 = vpack.c.bf16 %v1326_v29, %v1325_v39 }
 0x270   :  { %v1061_v57 = vpop.permute.xlu1 %1060 }
 0x271   :  { %v1277_v12 = vmax.f32 %v1213_v63, 0.0  ;;  %v1181_v21 = vmul.f32 %v3467_v11, %v1061_v57  ;;  %2648 = vmatprep.subr.bf16.mxu1 %v1374_v2  ;;  %v2811_v11 = vld [vmem:[%s4288_s2 + $0x8] ss:$16 sps:$4 sm:$0xff]  }
 0x273   :  { %v1245_v10 = vadd.f32 %v1181_v21, %v857_v32  ;;  %v1350_v31 = vpack.c.bf16 %v1278_v59, %v1277_v12 }
 0x275   :  { %v1309_v42 = vmax.f32 %v1245_v10, 0.0  ;;  %2609 = vmatpush3.bf16.msra.mxu0 %v1350_v31 }
 0x276   :  { %2731 = vmatprep.subr.bf16.mxu0 %v2832_v14 }
 0x277   :  { %v1366_v0 = vpack.c.bf16 %v1310_v18, %v1309_v42 }
 0x278   :  { %1488 = vmatmul.mubr.bf16.vlgmr.msra.gmra.mrb[0].mxu0 %v2808_v22 }
 0x279   :  { %2649 = vmatpush3.bf16.msra.mxu1 %v1366_v0  ;;  %1495 = vmatprep.mubr.bf16.mxu0 %v2814_v56 }
 0x27a   :  { %2732 = vmatpush3.bf16.msra.mxu0 %v2832_v14 }
 0x27b   :  { %2733 = vmatprep.subr.bf16.mxu0 %v2833_v38 }
 0x27c   :  { %1553 = vmatmul.mubr.bf16.vlgmr.msra.gmra.mrb[0].mxu1 %v2811_v11 }
 0x27d   :  { %1560 = vmatprep.mubr.bf16.mxu1 %v2817_v49 }
 0x27e   :  { %2734 = vmatpush3.bf16.msra.mxu0 %v2833_v38  ;;  %v2951_v38 = vmov 0.0  }
 0x27f   :  { %2735 = vmatprep.subr.bf16.mxu0 %v2834_v6  ;;  %2747 = vmatprep.subr.bf16.mxu1 %v2951_v38 }
 0x280   :  { %1496 = vmatmul.mubr.bf16.gmra.mrb[4].mxu0 %v2816_v37 }
 0x281   :  { %1503 = vmatprep.mubr.bf16.mxu0 %v2820_v1 }
 0x282   :  { %2736 = vmatpush3.bf16.msra.mxu0 %v2834_v6  ;;  %v2836_v6 = vld [vmem:[%s4291_s5] ss:$16 sps:$4 sm:$0xff]  }
 0x283   :  { %2737 = vmatprep.subr.bf16.mxu0 %v2835_v35 }
 0x284   :  { %1561 = vmatmul.mubr.bf16.gmra.mrb[4].mxu1 %v2819_v17 }
 0x285   :  { %1568 = vmatprep.mubr.bf16.mxu1 %v2823_v48 }
 0x286   :  { %2738 = vmatpush3.bf16.msra.mxu0 %v2835_v35  ;;  %v2838_v35 = vld [vmem:[%s4291_s5 + $0x4] ss:$16 sps:$4 sm:$0xff]  }
 0x287   :  { %1948 = vmatprep.subr.bf16.mxu0 %v2838_v35 }
 0x288   :  { %1504 = vmatmul.mubr.bf16.gmra.mrb[8].mxu0 %v2822_v61 }
 0x289   :  { %1511 = vmatprep.mubr.bf16.mxu0 %v2826_v43 }
 0x28c   :  { %1569 = vmatmul.mubr.bf16.gmra.mrb[8].mxu1 %v2825_v52 }
 0x28d   :  { %1576 = vmatprep.mubr.bf16.mxu1 %v2829_v34 }
 0x290   :  { %1512 = vmatmul.mubr.bf16.gmra.mrb[12].mxu0 %v2828_v5 }
 0x294   :  { %1577 = vmatmul.mubr.bf16.gmra.mrb[12].mxu1 %v2831_v20 }
 0x295   :  { %2755 = vmatprep.mubr.msk.bf16.mxu1 %vm2952_vm1, %v2951_v38 }
 0x34b   :  { %v2610_v27 = vpop.f32.mrb[0].mxu0 }
 0x34c   :  { %v2611_v9 = vpop.f32.mrb[1].mxu0 }
 0x34d   :  { %v2612_v36 = vadd.f32 %v2611_v9, %v2610_v27  ;;  %v2613_v24 = vpop.f32.mrb[2].mxu0  ;;  %v2844_v27 = vld [vmem:[%s4291_s5 + $0x24] ss:$16 sps:$4 sm:$0xff]   ;;  %v2842_v9 = vld [vmem:[%s4291_s5 + $0x20] ss:$16 sps:$4 sm:$0xff]  }
 0x34e   :  { %v2614_v46 = vpop.f32.mrb[3].mxu0 }
 0x34f   :  { %v2615_v45 = vadd.f32 %v2614_v46, %v2613_v24  ;;  %v2650_v7 = vpop.f32.mrb[0].mxu1  ;;  %v2848_v24 = vld [vmem:[%s4291_s5 + $0x40] ss:$16 sps:$4 sm:$0xff]   ;;  %v2856_v46 = vld [vmem:[%s4291_s5 + $0x64] ss:$16 sps:$4 sm:$0xff]  }
 0x350   :  { %v2651_v41 = vpop.f32.mrb[1].mxu1 }
 0x351   :  { %v2652_v60 = vadd.f32 %v2651_v41, %v2650_v7  ;;  %v2653_v62 = vpop.f32.mrb[2].mxu1  ;;  %v2862_v7 = vld [vmem:[%s4291_s5 + $0x84] ss:$16 sps:$4 sm:$0xff]   ;;  %v2860_v41 = vld [vmem:[%s4291_s5 + $0x80] ss:$16 sps:$4 sm:$0xff]  }
 0x352   :  { %v2654_v47 = vpop.f32.mrb[3].mxu1 }
 0x353   :  { %v1555_v3 = vadd.f32 %v2652_v60, %v2612_v36  ;;  %v2655_v44 = vadd.f32 %v2654_v47, %v2653_v62  ;;  %v2616_v15 = vpop.f32.mrb[4].mxu0  ;;  %v2850_v36 = vld [vmem:[%s4291_s5 + $0x44] ss:$16 sps:$4 sm:$0xff]   ;;  %v2866_v62 = vld [vmem:[%s4291_s5 + $0xa0] ss:$16 sps:$4 sm:$0xff]  }
 0x354   :  { %v2617_v13 = vpop.f32.mrb[5].mxu0  ;;  %v2868_v60 = vld [vmem:[%s4291_s5 + $0xa4] ss:$16 sps:$4 sm:$0xff]  }
 0x355   :  { %v1558_v54 = vadd.f32 %v2655_v44, %v2615_v45  ;;  %v2618_v53 = vadd.f32 %v2617_v13, %v2616_v15  ;;  %v2619_v19 = vpop.f32.mrb[6].mxu0  ;;  %v2854_v45 = vld [vmem:[%s4291_s5 + $0x60] ss:$16 sps:$4 sm:$0xff]   ;;  %v2874_v47 = vld [vmem:[%s4291_s5 + $0xc4] ss:$16 sps:$4 sm:$0xff]  }
 0x356   :  { %v2620_v40 = vpop.f32.mrb[7].mxu0  ;;  %v2880_v44 = vld [vmem:[%s4291_s5 + $0xe4] ss:$16 sps:$4 sm:$0xff]   ;;  %v2878_v15 = vld [vmem:[%s4291_s5 + $0xe0] ss:$16 sps:$4 sm:$0xff]  }
 0x357   :  { %v1585_v16 = vpack.c.bf16 %v1558_v54, %v1555_v3  ;;  %v2621_v4 = vadd.f32 %v2620_v40, %v2619_v19  ;;  %v2656_v23 = vpop.f32.mrb[4].mxu1  ;;  %v2872_v3 = vld [vmem:[%s4291_s5 + $0xc0] ss:$16 sps:$4 sm:$0xff]  }
 0x358   :  { %v2657_v29 = vpop.f32.mrb[5].mxu1 }
 0x359   :  { %v2658_v33 = vadd.f32 %v2657_v29, %v2656_v23  ;;  %v2659_v51 = vpop.f32.mrb[6].mxu1  ;;  %2739 = vmatprep.mubr.msk.bf16.mxu0 %vm1621_vm0, %v1585_v16 }
 0x35a   :  { %v2660_v8 = vpop.f32.mrb[7].mxu1 }
 0x35b   :  { %v1563_v55 = vadd.f32 %v2658_v33, %v2618_v53  ;;  %v2661_v28 = vadd.f32 %v2660_v8, %v2659_v51  ;;  %v2622_v39 = vpop.f32.mrb[8].mxu0 }
 0x35c   :  { %v2623_v50 = vpop.f32.mrb[9].mxu0 }
 0x35d   :  { %v1566_v25 = vadd.f32 %v2661_v28, %v2621_v4  ;;  %v2624_v26 = vadd.f32 %v2623_v50, %v2622_v39  ;;  %v2625_v63 = vpop.f32.mrb[10].mxu0 }
 0x35e   :  { %v2626_v2 = vpop.f32.mrb[11].mxu0 }
 0x35f   :  { %v1586_v59 = vpack.c.bf16 %v1566_v25, %v1563_v55  ;;  %v2627_v57 = vadd.f32 %v2626_v2, %v2625_v63  ;;  %v2662_v32 = vpop.f32.mrb[8].mxu1 }
 0x360   :  { %v2663_v58 = vpop.f32.mrb[9].mxu1 }
 0x361   :  { %v2664_v12 = vadd.f32 %v2663_v58, %v2662_v32  ;;  %v2665_v21 = vpop.f32.mrb[10].mxu1  ;;  %2740 = vmatmul.mubr.msk.bf16.vlgmr.msra.gmra.mrb[16].mxu0 %vm1621_vm0, %v1586_v59  ;;  %v2841_v59 = vld [vmem:[%s4291_s5 + $0xc] ss:$16 sps:$4 sm:$0xff]   ;;  %v2839_v32 = vld [vmem:[%s4291_s5 + $0x8] ss:$16 sps:$4 sm:$0xff]  }
 0x362   :  { %v2666_v10 = vpop.f32.mrb[11].mxu1  ;;  %1949 = vmatpush1.bf16.msra.mxu0 %v2836_v6  ;;  %v2847_v58 = vld [vmem:[%s4291_s5 + $0x2c] ss:$16 sps:$4 sm:$0xff]  }
 0x363   :  { %v1571_v31 = vadd.f32 %v2664_v12, %v2624_v26  ;;  %v2667_v22 = vadd.f32 %v2666_v10, %v2665_v21  ;;  %v2628_v18 = vpop.f32.mrb[12].mxu0  ;;  %1950 = vmatprep.subr.bf16.mxu0 %v2844_v27  ;;  %v2845_v12 = vld [vmem:[%s4291_s5 + $0x28] ss:$16 sps:$4 sm:$0xff]   ;;  %v2853_v21 = vld [vmem:[%s4291_s5 + $0x4c] ss:$16 sps:$4 sm:$0xff]  }
 0x364   :  { %v2629_v42 = vpop.f32.mrb[13].mxu0  ;;  %v2851_v10 = vld [vmem:[%s4291_s5 + $0x48] ss:$16 sps:$4 sm:$0xff]  }
 0x365   :  { %v1574_v56 = vadd.f32 %v2667_v22, %v2627_v57  ;;  %v2630_v0 = vadd.f32 %v2629_v42, %v2628_v18  ;;  %v2631_v11 = vpop.f32.mrb[14].mxu0  ;;  %v1707_v57 = vld [vmem:[%s4290_s4] sm:$0xf]  ;;  %v2857_v22 = vld [vmem:[%s4291_s5 + $0x68] ss:$16 sps:$4 sm:$0xff]  }
 0x366   :  { %v2632_v49 = vpop.f32.mrb[15].mxu0  ;;  %1951 = vmatpush1.bf16.msra.mxu0 %v2842_v9  ;;  %v2865_v18 = vld [vmem:[%s4291_s5 + $0x8c] ss:$16 sps:$4 sm:$0xff]   ;;  %v2863_v42 = vld [vmem:[%s4291_s5 + $0x88] ss:$16 sps:$4 sm:$0xff]  }
 0x367   :  { %v1587_v37 = vpack.c.bf16 %v1574_v56, %v1571_v31  ;;  %v2633_v1 = vadd.f32 %v2632_v49, %v2631_v11  ;;  %v2668_v17 = vpop.f32.mrb[12].mxu1  ;;  %1952 = vmatprep.subr.bf16.mxu0 %v2850_v36  ;;  %v2859_v31 = vld [vmem:[%s4291_s5 + $0x6c] ss:$16 sps:$4 sm:$0xff]   ;;  %v2875_v49 = vld [vmem:[%s4291_s5 + $0xc8] ss:$16 sps:$4 sm:$0xff]  }
 0x368   :  { %v2669_v48 = vpop.f32.mrb[13].mxu1  ;;  %v2871_v56 = vld [vmem:[%s4291_s5 + $0xac] ss:$16 sps:$4 sm:$0xff]  }
 0x369   :  { %v2670_v61 = vadd.f32 %v2669_v48, %v2668_v17  ;;  %v2671_v43 = vpop.f32.mrb[14].mxu1  ;;  %2743 = vmatprep.mubr.msk.bf16.mxu0 %vm1621_vm0, %v1587_v37  ;;  %v2877_v11 = vld [vmem:[%s4291_s5 + $0xcc] ss:$16 sps:$4 sm:$0xff]  }
 0x36a   :  { %v2672_v52 = vpop.f32.mrb[15].mxu1  ;;  %1953 = vmatpush1.bf16.msra.mxu0 %v2848_v24  ;;  %v2883_v37 = vld [vmem:[%s4291_s5 + $0xec] ss:$16 sps:$4 sm:$0xff]  }
 0x36b   :  { %v1579_v34 = vadd.f32 %v2670_v61, %v2630_v0  ;;  %v2673_v5 = vadd.f32 %v2672_v52, %v2671_v43  ;;  %1954 = vmatprep.subr.bf16.mxu0 %v2856_v46  ;;  %v2869_v0 = vld [vmem:[%s4291_s5 + $0xa8] ss:$16 sps:$4 sm:$0xff]  }
 0x36d   :  { %v1582_v20 = vadd.f32 %v2673_v5, %v2633_v1  ;;  %v2881_v1 = vld [vmem:[%s4291_s5 + $0xe8] ss:$16 sps:$4 sm:$0xff]  }
 0x36e   :  { %1955 = vmatpush1.bf16.msra.mxu0 %v2854_v45 }
 0x36f   :  { %v1588_v14 = vpack.c.bf16 %v1582_v20, %v1579_v34  ;;  %1956 = vmatprep.subr.bf16.mxu0 %v2862_v7 }
 0x371   :  { %2744 = vmatmul.mubr.msk.bf16.gmra.mrb[20].mxu0 %vm1621_vm0, %v1588_v14 }
 0x372   :  { %1980 = vmatprep.mubr.bf16.mxu0 %v4329_v30  ;;  %1957 = vmatpush1.bf16.msra.mxu0 %v2860_v41 }
 0x373   :  { %1958 = vmatprep.subr.bf16.mxu0 %v2868_v60 }
 0x376   :  { %1959 = vmatpush1.bf16.msra.mxu0 %v2866_v62  ;;  %v2886_v62 = vld [vmem:[%s4293_s7 + $0xc0] sm:$0xff]  }
 0x377   :  { %1960 = vmatprep.subr.bf16.mxu0 %v2874_v47 }
 0x37a   :  { %1961 = vmatpush1.bf16.msra.mxu0 %v2872_v3 }
 0x37b   :  { %1962 = vmatprep.subr.bf16.mxu0 %v2880_v44  ;;  %v2034_v44 = vld [vmem:[%s4292_s6] sm:$0x1] }
 0x37e   :  { %1963 = vmatpush1.bf16.msra.mxu0 %v2878_v15  ;;  %v2885_v15 = vld [vmem:[%s4293_s7] sm:$0xff]  }
 0x434   :  { %v2741_v13 = vpop.f32.mrb[16].mxu0 }
 0x435   :  { %v1668_v54 = vpop.f32.mrb[17].mxu0  ;;  %v1701_v19 = vmax.f32 %v2741_v13, 0.0  ;;  %v2887_v13 = vld [vmem:[%s4293_s7 + $0x80] sm:$0xff]  }
 0x436   :  { %v2742_v53 = vpop.f32.mrb[18].mxu0  ;;  %v1699_v4 = vmax.f32 %v1668_v54, 0.0  ;;  %v2888_v54 = vld [vmem:[%s4293_s7 + $0x48] sm:$0xff]  }
 0x437   :  { %v1702_v40 = vmax.f32 %v2742_v53, 0.0  ;;  %v1671_v16 = vpop.f32.mrb[19].mxu0  ;;  %v2890_v53 = vld [vmem:[%s4293_s7 + $0xc8] sm:$0xff]  }
 0x438   :  { %v1700_v23 = vmax.f32 %v1671_v16, 0.0  ;;  %v2892_v16 = vld [vmem:[%s4293_s7 + $0x50] sm:$0xff]  }
 0x439   :  { %v1709_v29 = vpack.c.bf16 %v1702_v40, %v1701_v19  ;;  %v2889_v19 = vld [vmem:[%s4293_s7 + $0x8] sm:$0xff]  }
 0x43a   :  { %v1708_v33 = vpack.c.bf16 %v1700_v23, %v1699_v4  ;;  %v2891_v40 = vld [vmem:[%s4293_s7 + $0x88] sm:$0xff]   ;;  %v2894_v4 = vld [vmem:[%s4293_s7 + $0xd0] sm:$0xff]  }
 0x43b   :  { %v2893_v23 = vld [vmem:[%s4293_s7 + $0x10] sm:$0xff]  }
 0x43c   :  { %2748 = vmatpush3.bf16.msra.mxu1 %v1708_v33  ;;  %v2896_v33 = vld [vmem:[%s4293_s7 + $0x58] sm:$0xff]  }
 0x43d   :  { %2749 = vmatprep.subr.bf16.mxu1 %v2951_v38 }
 0x440   :  { %2750 = vmatpush3.bf16.msra.mxu1 %v1709_v29  ;;  %v2895_v29 = vld [vmem:[%s4293_s7 + $0x90] sm:$0xff]  }
 0x441   :  { %2751 = vmatprep.subr.bf16.mxu1 %v2951_v38 }
 0x444   :  { %v2745_v51 = vpop.f32.mrb[20].mxu0 }
 0x445   :  { %v1684_v8 = vpop.f32.mrb[21].mxu0  ;;  %v1705_v28 = vmax.f32 %v2745_v51, 0.0  ;;  %v2898_v51 = vld [vmem:[%s4293_s7 + $0xd8] sm:$0xff]  }
 0x446   :  { %v2746_v55 = vpop.f32.mrb[22].mxu0  ;;  %v1703_v25 = vmax.f32 %v1684_v8, 0.0  ;;  %v2897_v8 = vld [vmem:[%s4293_s7 + $0x18] sm:$0xff]  }
 0x447   :  { %v1706_v39 = vmax.f32 %v2746_v55, 0.0  ;;  %v1687_v50 = vpop.f32.mrb[23].mxu0  ;;  %v2899_v55 = vld [vmem:[%s4293_s7 + $0x98] sm:$0xff]  }
 0x448   :  { %v1704_v26 = vmax.f32 %v1687_v50, 0.0  ;;  %v2901_v50 = vld [vmem:[%s4293_s7 + $0x20] sm:$0xff]  }
 0x449   :  { %v1711_v63 = vpack.c.bf16 %v1706_v39, %v1705_v28  ;;  %v2900_v28 = vld [vmem:[%s4293_s7 + $0x60] sm:$0xff]  }
 0x44a   :  { %v1710_v2 = vpack.c.bf16 %v1704_v26, %v1703_v25  ;;  %v2902_v39 = vld [vmem:[%s4293_s7 + $0xe0] sm:$0xff]   ;;  %v2904_v26 = vld [vmem:[%s4293_s7 + $0x68] sm:$0xff]  }
 0x44b   :  { %v2903_v25 = vld [vmem:[%s4293_s7 + $0xa0] sm:$0xff]  }
 0x44c   :  { %2752 = vmatpush3.bf16.msra.mxu1 %v1710_v2  ;;  %v2905_v2 = vld [vmem:[%s4293_s7 + $0x28] sm:$0xff]  }
 0x44d   :  { %2753 = vmatprep.subr.bf16.mxu1 %v2951_v38 }
 0x450   :  { %2754 = vmatpush3.bf16.msra.mxu1 %v1711_v63  ;;  %v2906_v63 = vld [vmem:[%s4293_s7 + $0xe8] sm:$0xff]  }
 0x451   :  { %1989 = vmatprep.subr.bf16.mxu1 %v2841_v59  ;;  %v2907_v59 = vld [vmem:[%s4293_s7 + $0xa8] sm:$0xff]  }
 0x453   :  { %2756 = vmatmul.mubr.msk.bf16.vlgmr.msra.gmra.mrb[16].mxu1 %vm1621_vm0, %v1707_v57  ;;  %v2908_v57 = vld [vmem:[%s4293_s7 + $0x70] sm:$0xff]  }
 0x454   :  { %1990 = vmatpush1.bf16.msra.mxu1 %v2839_v32  ;;  %2021 = vmatprep.mubr.bf16.mxu1 %v4329_v30  ;;  %v2910_v32 = vld [vmem:[%s4293_s7 + $0xf0] sm:$0xff]  }
 0x455   :  { %1991 = vmatprep.subr.bf16.mxu1 %v2847_v58  ;;  %v2909_v58 = vld [vmem:[%s4293_s7 + $0x30] sm:$0xff]  }
 0x458   :  { %1992 = vmatpush1.bf16.msra.mxu1 %v2845_v12  ;;  %v2911_v12 = vld [vmem:[%s4293_s7 + $0xb0] sm:$0xff]  }
 0x459   :  { %1993 = vmatprep.subr.bf16.mxu1 %v2853_v21  ;;  %v2912_v21 = vld [vmem:[%s4293_s7 + $0x78] sm:$0xff]  }
 0x45c   :  { %1994 = vmatpush1.bf16.msra.mxu1 %v2851_v10  ;;  %v2914_v10 = vld [vmem:[%s4293_s7 + $0xf8] sm:$0xff]  }
 0x45d   :  { %1995 = vmatprep.subr.bf16.mxu1 %v2859_v31  ;;  %v2913_v31 = vld [vmem:[%s4293_s7 + $0x38] sm:$0xff]  }
 0x460   :  { %1996 = vmatpush1.bf16.msra.mxu1 %v2857_v22  ;;  %v2915_v22 = vld [vmem:[%s4293_s7 + $0xb8] sm:$0xff]  }
 0x461   :  { %1997 = vmatprep.subr.bf16.mxu1 %v2865_v18 }
 0x464   :  { %1998 = vmatpush1.bf16.msra.mxu1 %v2863_v42 }
 0x465   :  { %1999 = vmatprep.subr.bf16.mxu1 %v2871_v56 }
 0x468   :  { %2000 = vmatpush1.bf16.msra.mxu1 %v2869_v0 }
 0x469   :  { %2001 = vmatprep.subr.bf16.mxu1 %v2877_v11 }
 0x46c   :  { %2002 = vmatpush1.bf16.msra.mxu1 %v2875_v49 }
 0x46d   :  { %2003 = vmatprep.subr.bf16.mxu1 %v2883_v37 }
 0x470   :  { %2004 = vmatpush1.bf16.msra.mxu1 %v2881_v1 }
 0x526   :  { %v1749_v17 = vpop.f32.mrb[16].mxu1 }
 0x527   :  { %v1755_v48 = vpack.c.bf16 %v1749_v17, %v1749_v17  ;;  %v2757_v61 = vpop.f32.mrb[17].mxu1 }
 0x528   :  { %v1752_v43 = vpop.f32.mrb[18].mxu1 }
 0x529   :  { %v2758_v52 = vpop.f32.mrb[19].mxu1  ;;  %1981 = vmatmul.mubr.bf16.vlgmr.msra.gmra.mrb[24].mxu0 %v1755_v48  ;;  %2022 = vmatmul.mubr.bf16.vlgmr.msra.gmra.mrb[20].mxu1 %v1755_v48 }
 0x52a   :  { %2088 = vmatprep.mubr.bf16.mxu0 %v4329_v30  ;;  %2129 = vmatprep.mubr.bf16.mxu1 %v4329_v30  ;;  %v2884_v30 = vld [vmem:[%s4293_s7 + $0x40] sm:$0xff]  }
 0x5fc   :  { %v1982_v34 = vpop.f32.mrb[24].mxu0  ;;  %v2023_v5 = vpop.f32.mrb[20].mxu1 }
 0x5fd   :  { %v2030_v20 = vmax.f32 %v1982_v34, 0.0  ;;  %v2032_v14 = vmax.f32 %v2023_v5, 0.0  ;;  %v1984_v38 = vpop.f32.mrb[25].mxu0  ;;  %v2025_v6 = vpop.f32.mrb[21].mxu1  ;;  %v2561_v5 = vld [vmem:[%s4294_s8] ss:$0 sm:$0xff] }
 0x5fe   :  { %v2031_v35 = vmax.f32 %v1984_v38, 0.0  ;;  %v2033_v27 = vmax.f32 %v2025_v6, 0.0  ;;  %v1986_v9 = vpop.f32.mrb[26].mxu0  ;;  %v2027_v36 = vpop.f32.mrb[22].mxu1 }
 0x5ff   :  { %v2035_v24 = vpack.c.bf16 %v2030_v20, %v2030_v20  ;;  %v2037_v46 = vpack.c.bf16 %v2032_v14, %v2032_v14  ;;  %v1987_v45 = vpop.f32.mrb[27].mxu0  ;;  %v2028_v7 = vpop.f32.mrb[23].mxu1 }
 0x600   :  { %v2036_v41 = vpack.c.bf16 %v2031_v35, %v2031_v35  ;;  %v2038_v60 = vpack.c.bf16 %v2033_v27, %v2033_v27 }
 0x601   :  { %v2045_v47 = vsel %vm2043_vm2, %v2035_v24, 0  ;;  %v2051_v3 = vsel %vm2043_vm2, %v2037_v46, 0 }
 0x602   :  { %2557 = vmatprep.subr.msk.bf16.mxu0 %vm2043_vm2, %v2036_v41  ;;  %2559 = vmatprep.subr.msk.bf16.mxu1 %vm2043_vm2, %v2038_v60 }
 0x603   :  { %2057 = vmatpush1.bf16.msra.mxu0 %v2045_v47  ;;  %2098 = vmatpush1.bf16.msra.mxu1 %v2051_v3 }
 0x604   :  { %2687 = vmatprep.subr.bf16.mxu0 %v2884_v30  ;;  %2709 = vmatprep.subr.bf16.mxu1 %v2886_v62 }
 0x606   :  { %2558 = vmatmul.mubr.msk.bf16.vlgmr.msra.gmra.mrb[28].mxu0 %vm2039_vm3, %v2034_v44  ;;  %2560 = vmatmul.mubr.msk.bf16.vlgmr.msra.gmra.mrb[24].mxu1 %vm2039_vm3, %v2034_v44 }
 0x607   :  { %2688 = vmatpush3.bf16.msra.mxu0 %v2885_v15  ;;  %2710 = vmatpush3.bf16.msra.mxu1 %v2887_v13 }
 0x608   :  { %2689 = vmatprep.subr.bf16.mxu0 %v2888_v54  ;;  %2711 = vmatprep.subr.bf16.mxu1 %v2890_v53 }
 0x60b   :  { %2690 = vmatpush3.bf16.msra.mxu0 %v2889_v19  ;;  %2712 = vmatpush3.bf16.msra.mxu1 %v2891_v40 }
 0x60c   :  { %2691 = vmatprep.subr.bf16.mxu0 %v2892_v16  ;;  %2713 = vmatprep.subr.bf16.mxu1 %v2894_v4 }
 0x60f   :  { %2692 = vmatpush3.bf16.msra.mxu0 %v2893_v23  ;;  %2714 = vmatpush3.bf16.msra.mxu1 %v2895_v29 }
 0x610   :  { %2693 = vmatprep.subr.bf16.mxu0 %v2896_v33  ;;  %2715 = vmatprep.subr.bf16.mxu1 %v2898_v51 }
 0x613   :  { %2694 = vmatpush3.bf16.msra.mxu0 %v2897_v8  ;;  %2716 = vmatpush3.bf16.msra.mxu1 %v2899_v55 }
 0x614   :  { %2695 = vmatprep.subr.bf16.mxu0 %v2900_v28  ;;  %2717 = vmatprep.subr.bf16.mxu1 %v2902_v39 }
 0x617   :  { %2696 = vmatpush3.bf16.msra.mxu0 %v2901_v50  ;;  %2718 = vmatpush3.bf16.msra.mxu1 %v2903_v25 }
 0x618   :  { %2697 = vmatprep.subr.bf16.mxu0 %v2904_v26  ;;  %2719 = vmatprep.subr.bf16.mxu1 %v2906_v63 }
 0x61b   :  { %2698 = vmatpush3.bf16.msra.mxu0 %v2905_v2  ;;  %2720 = vmatpush3.bf16.msra.mxu1 %v2907_v59 }
 0x61c   :  { %2699 = vmatprep.subr.bf16.mxu0 %v2908_v57  ;;  %2721 = vmatprep.subr.bf16.mxu1 %v2910_v32 }
 0x61f   :  { %2700 = vmatpush3.bf16.msra.mxu0 %v2909_v58  ;;  %2722 = vmatpush3.bf16.msra.mxu1 %v2911_v12 }
 0x620   :  { %2701 = vmatprep.subr.bf16.mxu0 %v2912_v21  ;;  %2723 = vmatprep.subr.bf16.mxu1 %v2914_v10 }
 0x623   :  { %2702 = vmatpush3.bf16.msra.mxu0 %v2913_v31  ;;  %2724 = vmatpush3.bf16.msra.mxu1 %v2915_v22 }
 0x6d9   :  { %v2090_v18 = vpop.f32.mrb[28].mxu0  ;;  %v2131_v42 = vpop.f32.mrb[24].mxu1 }
 0x6da   :  { %v2092_v56 = vpop.f32.mrb[29].mxu0  ;;  %v2140_v0 = vpack.c.bf16 %v2131_v42, %v2131_v42  ;;  %v2133_v11 = vpop.f32.mrb[25].mxu1  ;;  %v2138_v48 = vpack.c.bf16 %v2090_v18, %v2090_v18 }
 0x6db   :  { %v2139_v49 = vpack.c.bf16 %v2092_v56, %v2092_v56  ;;  %v2141_v37 = vpack.c.bf16 %v2133_v11, %v2133_v11  ;;  %v2094_v1 = vpop.f32.mrb[30].mxu0  ;;  %v2135_v17 = vpop.f32.mrb[26].mxu1 }
 0x6dc   :  { %v2095_v61 = vpop.f32.mrb[31].mxu0  ;;  %v2136_v43 = vpop.f32.mrb[27].mxu1 }
 0x6dd   :  { %2437 = vmatprep.mubr.bf16.mxu0 %v2139_v49  ;;  %2477 = vmatprep.mubr.bf16.mxu1 %v2141_v37 }
 0x6de   :  { %2438 = vmatmul.mubr.bf16.vlgmr.msra.gmra.mrb[32].mxu0 %v2138_v48  ;;  %2478 = vmatmul.mubr.bf16.vlgmr.msra.gmra.mrb[28].mxu1 %v2140_v0 }
 0x7b1   :  { %v2703_v52 = vpop.f32.mrb[32].mxu0  ;;  %v2725_v34 = vpop.f32.mrb[28].mxu1 }
 0x7b2   :  { %v2704_v20 = vpop.f32.mrb[33].mxu0  ;;  %v2726_v14 = vpop.f32.mrb[29].mxu1 }
 0x7b3   :  { %v2705_v38 = vadd.f32 %v2704_v20, %v2703_v52  ;;  %v2706_v6 = vpop.f32.mrb[34].mxu0  ;;  %v2727_v35 = vadd.f32 %v2726_v14, %v2725_v34  ;;  %v2728_v27 = vpop.f32.mrb[30].mxu1 }
 0x7b4   :  { %v2707_v9 = vpop.f32.mrb[35].mxu0  ;;  %v2729_v36 = vpop.f32.mrb[31].mxu1 }
 0x7b5   :  { %v2440_v24 = vadd.f32 %v2705_v38, %v2561_v5 }
 0x7b7   :  { %v2480_v46 = vadd.f32 %v2727_v35, %v2440_v24 }
 0x7b9   :  { %2485 = vst [vmem:[#allocation2] sm:$0x3] %v2480_v46 }
 0x7ba   :  { %2935 = shalt.err (!%p2932_p4)
}
 0x7bb   :  { %s2936_s21 = scalar_lea.hbm %s4295_s9, 32 }
 0x7bc   :  { %p2937_p5 = scmp.ne.s32.totalorder %s4295_s9, %s2936_s21  ;;  %p2940_p6 = scmp.lt.u32.totalorder %s2936_s21, %s4295_s9 }
 0x7be   :  { %p2942_p7 = pnand %p2940_p6, %p2937_p5 }
 0x7c0   :  { %2945 = shalt.err (!%p2942_p7)
}
 0x7c1   :  { %2495 = dma.vmem_to_hbm [thread:$0]  %s2493_s3, 32, %s4295_s9, [#allocation3]  }
 0x7c2   :  { %2946 = dma.done.wait [#allocation3], 32  }
 0x7c3   :  { %2947 = vsyncadd [#allocation3], 4294967264 }
 0x7c4   :  { %2499 = vsyncpa [#allocation3], 1 }

</bundles_post_ra>
